<compile_context>
chip_gen: v6e
topology: v6e:2x2x1
jax: 0.10.0
libtpu: 0.0.40
codegen_flags: <defaults>
</compile_context>

<pallas_src>
import jax
import jax.numpy as jnp
from jax.experimental import pallas as pl
from jax.experimental.pallas import tpu as pltpu

# ---- static sizes / PPO hyper-parameters (baked into the kernel) ----
STATE_DIM, HIDDEN, ACTION_DIM = 32, 32, 8
LANE = 128
TILE_B = 128          # batch rows per grid step
BETA = 0.01           # p_beta
EPSILON = 0.1         # p_epsilon
ACTOR_LOSS_W = 1.0    # actor_loss_weight
CRITIC_LOSS_W = 0.5   # critic_loss_weight

# x (bf16 matmul) slab columns
X_COL_ONE = STATE_DIM            # 32: constant-1 bias feature (states in [0,32))

# lane layout shared by z (MLP output), extras slab (f32) and output slab:
#   lanes [0,8) : actor logits      <-> old_actions        <-> probs
#   lane   8    : critic value      <-> ref_value          <-> value
#   lane   9    : (extras) advantage                       <-> action index
#   lane  10    : (extras) old log-prob (precomputed host-side)
Z_COL_VALUE = ACTION_DIM         # 8
EX_ADV = ACTION_DIM + 1          # 9  (extras slab)
EX_OLDLP = ACTION_DIM + 2        # 10 (extras slab)
OUT_ACTION = ACTION_DIM + 1      # 9  (output slab)


def _ppo_kernel(x_ref, e_ref, p_ref, out_ref, loss_ref):
    x = x_ref[...]                                   # (TB, 128) bf16
    e = e_ref[...]                                   # (TB, 128) f32
    w1 = p_ref[0:LANE, :]                            # (128, 128) bf16 fused layer-1
    w2 = p_ref[LANE:2 * LANE, :]                     # (128, 128) bf16 fused layer-2

    # ---- fused actor+critic MLP: 2 bf16 matmuls, biases folded via const-1 ----
    h = jnp.maximum(jnp.dot(x, w1, preferred_element_type=jnp.float32), 0.0)
    z = jnp.dot(h.astype(jnp.bfloat16), w2, preferred_element_type=jnp.float32)

    lane = jax.lax.broadcasted_iota(jnp.int32, z.shape, 1)
    is_act = lane < ACTION_DIM
    neg = jnp.float32(-1e30)

    # ---- masked full-width log-softmax over the 8 action lanes ----
    zl = jnp.where(is_act, z, neg)
    maxl = jnp.max(zl, axis=1, keepdims=True)                  # (TB,1)
    ex = jnp.exp(jnp.where(is_act, z - maxl, neg))             # 0 outside action lanes
    sum_e = jnp.sum(ex, axis=1, keepdims=True)                 # (TB,1)
    logp = jnp.where(is_act, (z - maxl) - jnp.log(sum_e), 0.0)
    probs = ex * pl.reciprocal(sum_e, approx=True)             # reuse exp, EUP recip

    # ---- deterministic action head: argmax(logits) ----
    # TODO(synk): the original DiscreteHead samples from Categorical(probs);
    # stochastic sampling is replaced by argmax for determinism.
    cand = jnp.where(zl >= maxl, lane, LANE)
    idx = jnp.min(cand, axis=1, keepdims=True)                 # (TB,1) int32

    # ---- per-tile loss partial SUMS (weighted / normalised in the wrapper) ----
    # critic MSE: value (z lane 8) vs ref_value (extras lane 8) — same lane, no slice
    diff = jnp.where(lane == Z_COL_VALUE, z - e, 0.0)
    sum_sq = jnp.sum(diff * diff)

    # clipped PPO surrogate: (log_prob - old_logprob) fused into ONE lane reduction
    sel = jnp.where(is_act, logp, jnp.where(lane == EX_OLDLP, -1.0, 0.0))
    delta = jnp.sum(sel * e, axis=1, keepdims=True)            # (TB,1)
    ratio = jnp.exp(delta)
    adv = e[:, EX_ADV:EX_ADV + 1]
    p1 = ratio * adv
    p2 = jnp.clip(ratio, 1.0 - EPSILON, 1.0 + EPSILON) * adv
    sum_pol = jnp.sum(-jnp.minimum(p1, p2))

    # entropy term (sum of NEGATIVE entropy; matches actor.entropy convention)
    sum_ent = jnp.sum(probs * logp)

    # ---- outputs: one full-width lane-dense store, no concatenate ----
    idx_f = idx.astype(jnp.float32)
    out_ref[...] = jnp.where(is_act, probs,
                   jnp.where(lane == Z_COL_VALUE, z,
                   jnp.where(lane == OUT_ACTION, idx_f, 0.0)))

    ll = jax.lax.broadcasted_iota(jnp.int32, (1, 8, LANE), 2)
    loss_ref[...] = jnp.where(ll == 0, sum_sq,
                    jnp.where(ll == 1, sum_pol,
                    jnp.where(ll == 2, sum_ent, 0.0)))


def pack_params(params):
    """Pack the 8 actor/critic tensors into one (256, 128) bf16 block-diagonal slab."""
    aw1, ab1, aw2, ab2, cw1, cb1, cw2, cb2 = params
    w1 = jnp.zeros((LANE, LANE), jnp.float32)
    w1 = w1.at[0:STATE_DIM, 0:HIDDEN].set(cw1)                  # critic layer-1
    w1 = w1.at[0:STATE_DIM, HIDDEN:2 * HIDDEN].set(aw1)         # actor  layer-1
    w1 = w1.at[X_COL_ONE, 0:HIDDEN].set(cb1[0])                 # critic bias-1
    w1 = w1.at[X_COL_ONE, HIDDEN:2 * HIDDEN].set(ab1[0])        # actor  bias-1
    w1 = w1.at[X_COL_ONE, LANE - 1].set(1.0)                    # carry const-1 to h[:,127]

    w2 = jnp.zeros((LANE, LANE), jnp.float32)
    w2 = w2.at[0:HIDDEN, Z_COL_VALUE].set(cw2[:, 0])            # critic layer-2 -> lane 8
    w2 = w2.at[HIDDEN:2 * HIDDEN, 0:ACTION_DIM].set(aw2)        # actor  layer-2 -> lanes 0..7
    w2 = w2.at[LANE - 1, Z_COL_VALUE].set(cb2[0, 0])            # critic bias-2
    w2 = w2.at[LANE - 1, 0:ACTION_DIM].set(ab2[0])              # actor  bias-2
    return jnp.concatenate([w1, w2], axis=0).astype(jnp.bfloat16)   # (256, 128) bf16


def _pack_inputs(states, ref_value, adv_value, old_actions, old_probs):
    b = states.shape[0]
    # bf16 matmul slab: states | const-1
    x = jnp.zeros((b, LANE), jnp.float32)
    x = x.at[:, 0:STATE_DIM].set(states)
    x = x.at[:, X_COL_ONE].set(1.0)
    x = x.astype(jnp.bfloat16)

    # old log-prob precomputed on the host (avoids 0*log(0) NaN and in-kernel log/reduce)
    old_logprob = jnp.sum(
        jnp.where(old_actions > 0,
                  jnp.log(jnp.maximum(old_probs, 1e-30)) * old_actions, 0.0),
        axis=1, keepdims=True)

    # f32 extras slab, lane-aligned with z: old_actions<->logits, ref_value<->value
    e = jnp.zeros((b, LANE), jnp.float32)
    e = e.at[:, 0:ACTION_DIM].set(old_actions)
    e = e.at[:, Z_COL_VALUE].set(ref_value[:, 0])
    e = e.at[:, EX_ADV].set(adv_value[:, 0])
    e = e.at[:, EX_OLDLP].set(old_logprob[:, 0])
    return x, e


@jax.jit
def ppo_forward(states, ref_value, adv_value, old_actions, old_probs, packed_params):
    """Returns ([values, actions, probs], loss) like PPO.forward (motivation=False)."""
    b = states.shape[0]
    tile_b = TILE_B if (b >= TILE_B and b % TILE_B == 0) else b
    assert b % tile_b == 0, "batch must be divisible by the tile size"
    num_tiles = b // tile_b

    x, e = _pack_inputs(states, ref_value, adv_value, old_actions, old_probs)

    out, loss_rows = pl.pallas_call(
        _ppo_kernel,
        grid=(num_tiles,),
        out_shape=(jax.ShapeDtypeStruct((b, LANE), jnp.float32),          # probs|value|action
                   jax.ShapeDtypeStruct((num_tiles, 8, LANE), jnp.float32)),  # loss partials
        in_specs=[pl.BlockSpec((tile_b, LANE), lambda i: (i, 0)),          # x (bf16)
                  pl.BlockSpec((tile_b, LANE), lambda i: (i, 0)),          # extras (f32)
                  pl.BlockSpec((2 * LANE, LANE), lambda i: (0, 0))],       # params, resident
        out_specs=(pl.BlockSpec((tile_b, LANE), lambda i: (i, 0)),
                   pl.BlockSpec((1, 8, LANE), lambda i: (i, 0, 0))),
        compiler_params=pltpu.CompilerParams(dimension_semantics=("parallel",)),
    )(x, e, packed_params)

    values = out[:, Z_COL_VALUE:Z_COL_VALUE + 1]
    probs = out[:, 0:ACTION_DIM]
    actions = jax.nn.one_hot(out[:, OUT_ACTION].astype(jnp.int32),
                             ACTION_DIM, dtype=jnp.float32)

    partial = jnp.sum(loss_rows[:, 0, :], axis=0)                # (128,) partial sums
    inv_b = 1.0 / b
    loss = (partial[0] * inv_b * CRITIC_LOSS_W
            + partial[1] * inv_b * ACTOR_LOSS_W
            + BETA * partial[2] * inv_b)
    return [values, actions, probs], loss


def init_params(key):
    """Deterministic actor-critic MLP parameters (biases kept 2-D)."""
    ks = jax.random.split(key, 4)
    scale = 0.1
    aw1 = scale * jax.random.normal(ks[0], (STATE_DIM, HIDDEN), jnp.float32)
    ab1 = jnp.zeros((1, HIDDEN), jnp.float32)
    aw2 = scale * jax.random.normal(ks[1], (HIDDEN, ACTION_DIM), jnp.float32)
    ab2 = jnp.zeros((1, ACTION_DIM), jnp.float32)
    cw1 = scale * jax.random.normal(ks[2], (STATE_DIM, HIDDEN), jnp.float32)
    cb1 = jnp.zeros((1, HIDDEN), jnp.float32)
    cw2 = scale * jax.random.normal(ks[3], (HIDDEN, 1), jnp.float32)
    cb2 = jnp.zeros((1, 1), jnp.float32)
    return (aw1, ab1, aw2, ab2, cw1, cb1, cw2, cb2)


if __name__ == "__main__":
    key = jax.random.PRNGKey(0)
    k_p, k_s, k_r, k_a, k_act, k_op = jax.random.split(key, 6)

    B = 256   # 2 batch tiles of 128 rows -> exercises the (parallel) grid
    packed_params = pack_params(init_params(k_p))

    states = jax.random.normal(k_s, (B, STATE_DIM), jnp.float32)
    ref_value = jax.random.normal(k_r, (B, 1), jnp.float32)
    adv_value = jax.random.normal(k_a, (B, 1), jnp.float32)
    old_action_idx = jax.random.randint(k_act, (B,), 0, ACTION_DIM)
    old_actions = jax.nn.one_hot(old_action_idx, ACTION_DIM, dtype=jnp.float32)
    old_probs = jax.nn.softmax(
        jax.random.normal(k_op, (B, ACTION_DIM), jnp.float32), axis=1)

    (values, actions, probs), loss = ppo_forward(
        states, ref_value, adv_value, old_actions, old_probs, packed_params)
    jax.block_until_ready((values, actions, probs, loss))

    assert values.shape == (B, 1)
    assert actions.shape == (B, ACTION_DIM)
    assert probs.shape == (B, ACTION_DIM)
    assert loss.shape == ()
    assert bool(jnp.isfinite(loss))
    assert bool(jnp.all(jnp.isfinite(probs)))
    print("KERNEL_OK")
</pallas_src>

<mosaic_0001>
module attributes {stable_mosaic.version = 11 : i64} {
  func.func @_ppo_kernel(%arg0: i32, %arg1: memref<128x128xbf16, #tpu.memory_space<vmem>>, %arg2: memref<128x128xf32, #tpu.memory_space<vmem>>, %arg3: memref<256x128xbf16, #tpu.memory_space<vmem>>, %arg4: memref<128x128xf32, #tpu.memory_space<vmem>>, %arg5: memref<1x8x128xf32, #tpu.memory_space<vmem>>) attributes {dimension_semantics = [#tpu.dimension_semantics<parallel>], iteration_bounds = array<i64: 2>, scalar_prefetch = 0 : i64, scratch_operands = 0 : i64, tpu.core_type = #tpu.core_type<tc>, window_params = [{transform_indices = @transform_0, window_bounds = array<i64: 128, 128>}, {transform_indices = @transform_1, window_bounds = array<i64: 128, 128>}, {pipeline_mode = #tpu.pipeline_mode<synchronous>, transform_indices = @transform_2, window_bounds = array<i64: 256, 128>}, {transform_indices = @transform_3, window_bounds = array<i64: 128, 128>}, {transform_indices = @transform_4, window_bounds = array<i64: 1, 8, 128>}]} {
    %c0 = arith.constant 0 : index
    %c0_0 = arith.constant 0 : index
    %0 = vector.load %arg1[%c0, %c0_0] : memref<128x128xbf16, #tpu.memory_space<vmem>>, vector<128x128xbf16>
    %c0_1 = arith.constant 0 : index
    %c0_2 = arith.constant 0 : index
    %1 = vector.load %arg2[%c0_1, %c0_2] : memref<128x128xf32, #tpu.memory_space<vmem>>, vector<128x128xf32>
    %c0_3 = arith.constant 0 : index
    %c0_4 = arith.constant 0 : index
    %2 = vector.load %arg3[%c0_3, %c0_4] : memref<256x128xbf16, #tpu.memory_space<vmem>>, vector<128x128xbf16>
    %c128 = arith.constant 128 : index
    %c0_5 = arith.constant 0 : index
    %3 = vector.load %arg3[%c128, %c0_5] : memref<256x128xbf16, #tpu.memory_space<vmem>>, vector<128x128xbf16>
    %cst = arith.constant dense<0.000000e+00> : vector<128x128xf32>
    %4 = tpu.matmul %0, %2, %cst {dimension_numbers = #tpu.dot_dimension_numbers<[1], [0], [0], [1], [0, 0, 1, 1], [], []>} : vector<128x128xbf16>, vector<128x128xbf16>, vector<128x128xf32> -> vector<128x128xf32>
    %cst_6 = arith.constant 0.000000e+00 : f32
    %5 = vector.broadcast %cst_6 : f32 to vector<128x128xf32>
    %6 = arith.maximumf %4, %5 : vector<128x128xf32>
    %7 = arith.truncf %6 : vector<128x128xf32> to vector<128x128xbf16>
    %cst_7 = arith.constant dense<0.000000e+00> : vector<128x128xf32>
    %8 = tpu.matmul %7, %3, %cst_7 {dimension_numbers = #tpu.dot_dimension_numbers<[1], [0], [0], [1], [0, 0, 1, 1], [], []>} : vector<128x128xbf16>, vector<128x128xbf16>, vector<128x128xf32> -> vector<128x128xf32>
    %9 = tpu.iota {dimensions = array<i32: 1>} : vector<128x128xi32>
    %c8_i32 = arith.constant 8 : i32
    %10 = vector.broadcast %c8_i32 : i32 to vector<128x128xi32>
    %11 = arith.cmpi slt, %9, %10 : vector<128x128xi32>
    %cst_8 = arith.constant -1.000000e+30 : f32
    %12 = vector.broadcast %cst_8 : f32 to vector<128x128xf32>
    %13 = arith.select %11, %8, %12 : vector<128x128xi1>, vector<128x128xf32>
    %cst_9 = arith.constant dense<0xFF800000> : vector<128xf32>
    %14 = vector.multi_reduction <maximumf>, %13, %cst_9 [1] : vector<128x128xf32> to vector<128xf32>
    %15 = vector.shape_cast %14 : vector<128xf32> to vector<128x1xf32>
    %16 = vector.broadcast %15 : vector<128x1xf32> to vector<128x128xf32>
    %17 = arith.subf %8, %16 : vector<128x128xf32>
    %cst_10 = arith.constant -1.000000e+30 : f32
    %18 = vector.broadcast %cst_10 : f32 to vector<128x128xf32>
    %19 = arith.select %11, %17, %18 : vector<128x128xi1>, vector<128x128xf32>
    %20 = math.exp %19 : vector<128x128xf32>
    %cst_11 = arith.constant dense<0.000000e+00> : vector<128xf32>
    %21 = vector.multi_reduction <add>, %20, %cst_11 [1] : vector<128x128xf32> to vector<128xf32>
    %22 = vector.shape_cast %21 : vector<128xf32> to vector<128x1xf32>
    %23 = vector.broadcast %15 : vector<128x1xf32> to vector<128x128xf32>
    %24 = arith.subf %8, %23 : vector<128x128xf32>
    %25 = math.log %22 : vector<128x1xf32>
    %26 = vector.broadcast %25 : vector<128x1xf32> to vector<128x128xf32>
    %27 = arith.subf %24, %26 : vector<128x128xf32>
    %cst_12 = arith.constant 0.000000e+00 : f32
    %28 = vector.broadcast %cst_12 : f32 to vector<128x128xf32>
    %29 = arith.select %11, %27, %28 : vector<128x128xi1>, vector<128x128xf32>
    %30 = tpu.reciprocal %22 {approx = true} : vector<128x1xf32> -> vector<128x1xf32>
    %31 = vector.broadcast %30 : vector<128x1xf32> to vector<128x128xf32>
    %32 = arith.mulf %20, %31 : vector<128x128xf32>
    %33 = vector.broadcast %15 : vector<128x1xf32> to vector<128x128xf32>
    %34 = arith.cmpf oge, %13, %33 : vector<128x128xf32>
    %c128_i32 = arith.constant 128 : i32
    %35 = vector.broadcast %c128_i32 : i32 to vector<128x128xi32>
    %36 = arith.select %34, %9, %35 : vector<128x128xi1>, vector<128x128xi32>
    %cst_13 = arith.constant dense<2147483647> : vector<128xi32>
    %37 = vector.multi_reduction <minsi>, %36, %cst_13 [1] : vector<128x128xi32> to vector<128xi32>
    %38 = vector.shape_cast %37 : vector<128xi32> to vector<128x1xi32>
    %c8_i32_14 = arith.constant 8 : i32
    %39 = vector.broadcast %c8_i32_14 : i32 to vector<128x128xi32>
    %40 = arith.cmpi eq, %9, %39 : vector<128x128xi32>
    %41 = arith.subf %8, %1 : vector<128x128xf32>
    %cst_15 = arith.constant 0.000000e+00 : f32
    %42 = vector.broadcast %cst_15 : f32 to vector<128x128xf32>
    %43 = arith.select %40, %41, %42 : vector<128x128xi1>, vector<128x128xf32>
    %44 = arith.mulf %43, %43 : vector<128x128xf32>
    %45 = vector.shape_cast %44 : vector<128x128xf32> to vector<1x128x128xf32>
    %cst_16 = arith.constant dense<0.000000e+00> : vector<1xf32>
    %46 = vector.multi_reduction <add>, %45, %cst_16 [1, 2] : vector<1x128x128xf32> to vector<1xf32>
    %47 = vector.shape_cast %46 : vector<1xf32> to vector<1x1x1xf32>
    %48 = vector.extract %47[0, 0, 0] : f32 from vector<1x1x1xf32>
    %c10_i32 = arith.constant 10 : i32
    %49 = vector.broadcast %c10_i32 : i32 to vector<128x128xi32>
    %50 = arith.cmpi eq, %9, %49 : vector<128x128xi32>
    %cst_17 = arith.constant -1.000000e+00 : f32
    %cst_18 = arith.constant 0.000000e+00 : f32
    %51 = vector.broadcast %cst_17 : f32 to vector<128x128xf32>
    %52 = vector.broadcast %cst_18 : f32 to vector<128x128xf32>
    %53 = arith.select %50, %51, %52 : vector<128x128xi1>, vector<128x128xf32>
    %54 = arith.select %11, %29, %53 : vector<128x128xi1>, vector<128x128xf32>
    %55 = arith.mulf %54, %1 : vector<128x128xf32>
    %cst_19 = arith.constant dense<0.000000e+00> : vector<128xf32>
    %56 = vector.multi_reduction <add>, %55, %cst_19 [1] : vector<128x128xf32> to vector<128xf32>
    %57 = vector.shape_cast %56 : vector<128xf32> to vector<128x1xf32>
    %58 = math.exp %57 : vector<128x1xf32>
    %59 = vector.extract_strided_slice %1 {offsets = [0, 9], sizes = [128, 1], strides = [1, 1]} : vector<128x128xf32> to vector<128x1xf32>
    %60 = arith.mulf %58, %59 : vector<128x1xf32>
    %cst_20 = arith.constant 0.899999976 : f32
    %cst_21 = arith.constant 1.100000e+00 : f32
    %61 = vector.broadcast %cst_20 : f32 to vector<128x1xf32>
    %62 = arith.maximumf %61, %58 : vector<128x1xf32>
    %63 = vector.broadcast %cst_21 : f32 to vector<128x1xf32>
    %64 = arith.minimumf %63, %62 : vector<128x1xf32>
    %65 = arith.mulf %64, %59 : vector<128x1xf32>
    %66 = arith.minimumf %60, %65 : vector<128x1xf32>
    %cst_22 = arith.constant 0.000000e+00 : f32
    %67 = vector.broadcast %cst_22 : f32 to vector<128x1xf32>
    %68 = arith.subf %67, %66 : vector<128x1xf32>
    %69 = vector.shape_cast %68 : vector<128x1xf32> to vector<1x128x1xf32>
    %cst_23 = arith.constant dense<0.000000e+00> : vector<1xf32>
    %70 = vector.multi_reduction <add>, %69, %cst_23 [1, 2] : vector<1x128x1xf32> to vector<1xf32>
    %71 = vector.shape_cast %70 : vector<1xf32> to vector<1x1x1xf32>
    %72 = vector.extract %71[0, 0, 0] : f32 from vector<1x1x1xf32>
    %73 = arith.mulf %32, %29 : vector<128x128xf32>
    %74 = vector.shape_cast %73 : vector<128x128xf32> to vector<1x128x128xf32>
    %cst_24 = arith.constant dense<0.000000e+00> : vector<1xf32>
    %75 = vector.multi_reduction <add>, %74, %cst_24 [1, 2] : vector<1x128x128xf32> to vector<1xf32>
    %76 = vector.shape_cast %75 : vector<1xf32> to vector<1x1x1xf32>
    %77 = vector.extract %76[0, 0, 0] : f32 from vector<1x1x1xf32>
    %78 = arith.sitofp %38 : vector<128x1xi32> to vector<128x1xf32>
    %c8_i32_25 = arith.constant 8 : i32
    %79 = vector.broadcast %c8_i32_25 : i32 to vector<128x128xi32>
    %80 = arith.cmpi eq, %9, %79 : vector<128x128xi32>
    %c9_i32 = arith.constant 9 : i32
    %81 = vector.broadcast %c9_i32 : i32 to vector<128x128xi32>
    %82 = arith.cmpi eq, %9, %81 : vector<128x128xi32>
    %cst_26 = arith.constant 0.000000e+00 : f32
    %83 = vector.shape_cast %78 : vector<128x1xf32> to vector<128x1xf32>
    %84 = vector.broadcast %83 : vector<128x1xf32> to vector<128x128xf32>
    %85 = vector.broadcast %cst_26 : f32 to vector<128x128xf32>
    %86 = arith.select %82, %84, %85 : vector<128x128xi1>, vector<128x128xf32>
    %87 = arith.select %80, %8, %86 : vector<128x128xi1>, vector<128x128xf32>
    %88 = arith.select %11, %32, %87 : vector<128x128xi1>, vector<128x128xf32>
    %c0_27 = arith.constant 0 : index
    %c0_28 = arith.constant 0 : index
    %89 = vector.load %arg4[%c0_27, %c0_28] : memref<128x128xf32, #tpu.memory_space<vmem>>, vector<128x128xf32>
    tpu.vector_store %arg4[%c0_27, %c0_28], %88 {strides = array<i32>} : memref<128x128xf32, #tpu.memory_space<vmem>>, vector<128x128xf32>,
    %90 = tpu.iota {dimensions = array<i32: 2>} : vector<1x8x128xi32>
    %c0_i32 = arith.constant 0 : i32
    %91 = vector.broadcast %c0_i32 : i32 to vector<1x8x128xi32>
    %92 = arith.cmpi eq, %90, %91 : vector<1x8x128xi32>
    %c1_i32 = arith.constant 1 : i32
    %93 = vector.broadcast %c1_i32 : i32 to vector<1x8x128xi32>
    %94 = arith.cmpi eq, %90, %93 : vector<1x8x128xi32>
    %c2_i32 = arith.constant 2 : i32
    %95 = vector.broadcast %c2_i32 : i32 to vector<1x8x128xi32>
    %96 = arith.cmpi eq, %90, %95 : vector<1x8x128xi32>
    %cst_29 = arith.constant 0.000000e+00 : f32
    %97 = vector.broadcast %77 : f32 to vector<1x8x128xf32>
    %98 = vector.broadcast %cst_29 : f32 to vector<1x8x128xf32>
    %99 = arith.select %96, %97, %98 : vector<1x8x128xi1>, vector<1x8x128xf32>
    %100 = vector.broadcast %72 : f32 to vector<1x8x128xf32>
    %101 = arith.select %94, %100, %99 : vector<1x8x128xi1>, vector<1x8x128xf32>
    %102 = vector.broadcast %48 : f32 to vector<1x8x128xf32>
    %103 = arith.select %92, %102, %101 : vector<1x8x128xi1>, vector<1x8x128xf32>
    %c0_30 = arith.constant 0 : index
    %c0_31 = arith.constant 0 : index
    %c0_32 = arith.constant 0 : index
    %104 = vector.load %arg5[%c0_30, %c0_31, %c0_32] : memref<1x8x128xf32, #tpu.memory_space<vmem>>, vector<1x8x128xf32>
    tpu.vector_store %arg5[%c0_30, %c0_31, %c0_32], %103 {strides = array<i32>} : memref<1x8x128xf32, #tpu.memory_space<vmem>>, vector<1x8x128xf32>,
    return
  }
  func.func @transform_0(%arg0: i32) -> (i32, i32) {
    %c0_i32 = arith.constant 0 : i32
    %c0_i32_0 = arith.constant 0 : i32
    return %arg0, %c0_i32 : i32, i32
  }
  func.func @transform_1(%arg0: i32) -> (i32, i32) {
    %c0_i32 = arith.constant 0 : i32
    %c0_i32_0 = arith.constant 0 : i32
    return %arg0, %c0_i32 : i32, i32
  }
  func.func @transform_2(%arg0: i32) -> (i32, i32) {
    %c0_i32 = arith.constant 0 : i32
    %c0_i32_0 = arith.constant 0 : i32
    %c0_i32_1 = arith.constant 0 : i32
    return %c0_i32, %c0_i32_0 : i32, i32
  }
  func.func @transform_3(%arg0: i32) -> (i32, i32) {
    %c0_i32 = arith.constant 0 : i32
    %c0_i32_0 = arith.constant 0 : i32
    return %arg0, %c0_i32 : i32, i32
  }
  func.func @transform_4(%arg0: i32) -> (i32, i32, i32) {
    %c0_i32 = arith.constant 0 : i32
    %c0_i32_0 = arith.constant 0 : i32
    %c0_i32_1 = arith.constant 0 : i32
    return %arg0, %c0_i32, %c0_i32_0 : i32, i32, i32
  }
}

</mosaic_0001>

<bundles_post_ra>
// kernel: mul.6
= control target key start
LH: loop header
LB: loop body
LE: loop exit
PB: predicated region body
PF: predicated region fallthrough
CT: control target
= control target key end

     0   :  { %s56_s0 = inlined_call_operand.vmem [shape: f32[256,8], index: 0, kind: input, shape index: {}]   ;;  %s57_s1 = inlined_call_operand.vmem [shape: f32[256,8], index: 1, kind: input, shape index: {}]   ;;  %s58_s2 = inlined_call_operand.vmem [shape: f32[256,8], index: 2, kind: output, shape index: {}]  }
   0x1   :  { %v3_v0 = vld [vmem:[%s56_s0] sm:$0xff]  ;;  %v20_v2 = vld [vmem:[%s56_s0 + $0x8] sm:$0xff] }
   0x2   :  { %v4_v1 = vld [vmem:[%s57_s1] sm:$0xff]  ;;  %v21_v4 = vld [vmem:[%s57_s1 + $0x8] sm:$0xff] }
   0x3   :  { %v7_v3 = vmul.f32 %v4_v1, %v3_v0  ;;  %v16_v5 = vmul.f32 %v21_v4, %v20_v2 }
   0x5   :  { %9 = vst [vmem:[%s58_s2] sm:$0xff] %v7_v3  ;;  %22 = vst [vmem:[%s58_s2 + $0x8] sm:$0xff] %v16_v5 }

// kernel: ppo_forward.1
= control target key start
LH: loop header
LB: loop body
LE: loop exit
PB: predicated region body
PF: predicated region fallthrough
CT: control target
= control target key end

     0   :  { %s2099_s15 = smov 0   ;;  %s3279_s0 = inlined_call_operand.vmem [shape: bf16[256,128], index: 0, kind: input, shape index: {}]   ;;  %s3280_s1 = inlined_call_operand.vmem [shape: f32[256,128], index: 1, kind: input, shape index: {}]   ;;  %s3281_s2 = inlined_call_operand.vmem [shape: bf16[256,128], index: 2, kind: input, shape index: {}]   ;;  %s3282_s3 = inlined_call_operand.vmem [shape: f32[256,128], index: 3, kind: output, shape index: {0}]   ;;  %s3283_s4 = inlined_call_operand.vmem [shape: f32[2,8,128], index: 4, kind: output, shape index: {1}]  }
   0x1 LB: > { %s2105_s16 = sadd.s32 4294967295, %s2070_s15   ;;  %p1766_p0 = scmp.ge.s32.totalorder %s2070_s15, 1  ;;  %s2070_s15 = sphi %s2099_s15, %s15_s15  }
   0x2   : > { %p177_p1 = scmp.lt.s32.totalorder %s2070_s15, 3 }
   0x4   : > { %p178_p2 = pnand %p1766_p0, %p177_p1 }
   0x6   : > { %181 = sbr.rel (%p178_p2) target bundleno = 1314 (0x522), region = 32 }
   0xb   : > { %v1912_v0 = vld [vmem:[%s3281_s2 + $0x38] sm:$0xff]   ;;  %s1767_s19 = sshll.u32 %s2105_s16, 4  ;;  %v1913_v1 = vld [vmem:[%s3281_s2 + $0x30] sm:$0xff]   ;;  %v1914_v2 = vld [vmem:[%s3281_s2 + $0x28] sm:$0xff]   ;;  %s2073_s9 = smov 119  }
   0xc   : > { %p213_p3 = scmp.lt.s32.totalorder %s1767_s19, 31  ;;  %1832 = vmatprep.subr.bf16.mxu0 %v1912_v0  ;;  %v1915_v3 = vld [vmem:[%s3281_s2 + $0x20] sm:$0xff]   ;;  %v1916_v5 = vld [vmem:[%s3281_s2 + $0x18] sm:$0xff]   ;;  %v1917_v6 = vld [vmem:[%s3281_s2 + $0x10] sm:$0xff]   ;;  %p230_p4 = scmp.lt.s32.totalorder %s2105_s16, 1 }
   0xd   : > { %1833 = vmatpush3.bf16.msra.mxu0 %v1912_v0  ;;  %v1928_v7 = vld [vmem:[%s3281_s2 + $0x78] sm:$0xff]   ;;  %v1929_v8 = vld [vmem:[%s3281_s2 + $0x70] sm:$0xff]   ;;  %v1918_v9 = vld [vmem:[%s3281_s2 + $0x8] sm:$0xff]   ;;  %v661_v0 = vlaneseq }
   0xe   : > { %s3452_s19 = smov (!%p213_p3, %s1767_s19), 31  ;;  %1834 = vmatprep.subr.bf16.mxu0 %v1913_v1  ;;  %1864 = vmatprep.subr.bf16.mxu1 %v1928_v7  ;;  %v1930_v10 = vld [vmem:[%s3281_s2 + $0x68] sm:$0xff]   ;;  %v1919_v11 = vld [vmem:[%s3281_s2] sm:$0xff]   ;;  %v1932_v13 = vld [vmem:[%s3281_s2 + $0x58] sm:$0xff]   ;;  %s3454_s16 = smov (!%p230_p4, %s2105_s16), 1 }
   0xf   : > { %s1768_s24 = sshll.u32 %s3452_s19, 2  ;;  %1865 = vmatpush3.bf16.msra.mxu1 %v1928_v7  ;;  %v1931_v12 = vld [vmem:[%s3281_s2 + $0x60] sm:$0xff]   ;;  %v1933_v21 = vld [vmem:[%s3281_s2 + $0x50] sm:$0xff]   ;;  %v1934_v22 = vld [vmem:[%s3281_s2 + $0x48] sm:$0xff]   ;;  %s1773_s14 = sshll.u32 %s3454_s16, 3 }
  0x10   : > { %s2125_s27 = scalar_lea.vmem %s3279_s0, %s1768_s24  ;;  %1866 = vmatprep.subr.bf16.mxu1 %v1929_v8  ;;  %v1935_v23 = vld [vmem:[%s3281_s2 + $0x40] sm:$0xff]   ;;  %s233_s20 = scalar_lea.vmem %s3283_s4, %s1773_s14 }
  0x11   : > { %1835 = vmatpush3.bf16.msra.mxu0 %v1913_v1  ;;  %v1920_v4 = vld [vmem:[%s2125_s27] sm:$0xff]   ;;  %v1921_v14 = vld [vmem:[%s2125_s27 + $0x8] sm:$0xff]   ;;  %v1922_v15 = vld [vmem:[%s2125_s27 + $0x10] sm:$0xff]   ;;  %v2174_v1 = vand.u32 127, %v661_v0 }
  0x12   : > { %1836 = vmatprep.subr.bf16.mxu0 %v1914_v2  ;;  %1848 = vmatprep.mubr.bf16.mxu0 %v1920_v4  ;;  %v1923_v16 = vld [vmem:[%s2125_s27 + $0x18] sm:$0xff]   ;;  %v1924_v17 = vld [vmem:[%s2125_s27 + $0x20] sm:$0xff]   ;;  %v1925_v18 = vld [vmem:[%s2125_s27 + $0x28] sm:$0xff]  }
  0x13   : > { %1867 = vmatpush3.bf16.msra.mxu1 %v1929_v8  ;;  %v1926_v19 = vld [vmem:[%s2125_s27 + $0x30] sm:$0xff]   ;;  %v1927_v20 = vld [vmem:[%s2125_s27 + $0x38] sm:$0xff]   ;;  %vm663_vm0 = vcmp.lt.s32.totalorder %v2174_v1, 8  ;;  %vm1233_vm1 = vcmp.eq.s32.totalorder %v2174_v1, 10  ;;  %s1770_s27 = sshll.u32 %s3452_s19, 3  ;;  %vm1160_vm2 = vcmp.eq.s32.totalorder %v2174_v1, 8 }
  0x14   : > { %1868 = vmatprep.subr.bf16.mxu1 %v1930_v10  ;;  %s2507_s8 = scalar_lea.vmem %s3280_s1, %s1770_s27  ;;  %s3097_s12 = scalar_lea.vmem %s3282_s3, %s1770_s27 }
  0x15   : > { %1837 = vmatpush3.bf16.msra.mxu0 %v1914_v2 }
  0x16   : > { %1838 = vmatprep.subr.bf16.mxu0 %v1915_v3 }
  0x17   : > { %1869 = vmatpush3.bf16.msra.mxu1 %v1930_v10 }
  0x18   : > { %1870 = vmatprep.subr.bf16.mxu1 %v1931_v12 }
  0x19   : > { %1839 = vmatpush3.bf16.msra.mxu0 %v1915_v3 }
  0x1a   : > { %1840 = vmatprep.subr.bf16.mxu0 %v1916_v5 }
  0x1b   : > { %1871 = vmatpush3.bf16.msra.mxu1 %v1931_v12 }
  0x1c   : > { %1872 = vmatprep.subr.bf16.mxu1 %v1932_v13 }
  0x1d   : > { %1841 = vmatpush3.bf16.msra.mxu0 %v1916_v5 }
  0x1e   : > { %1842 = vmatprep.subr.bf16.mxu0 %v1917_v6 }
  0x1f   : > { %1873 = vmatpush3.bf16.msra.mxu1 %v1932_v13 }
  0x20   : > { %1874 = vmatprep.subr.bf16.mxu1 %v1933_v21 }
  0x21   : > { %1843 = vmatpush3.bf16.msra.mxu0 %v1917_v6 }
  0x22   : > { %1844 = vmatprep.subr.bf16.mxu0 %v1918_v9 }
  0x23   : > { %1875 = vmatpush3.bf16.msra.mxu1 %v1933_v21 }
  0x24   : > { %1876 = vmatprep.subr.bf16.mxu1 %v1934_v22 }
  0x25   : > { %1845 = vmatpush3.bf16.msra.mxu0 %v1918_v9 }
  0x26   : > { %1846 = vmatprep.subr.bf16.mxu0 %v1919_v11 }
  0x27   : > { %1877 = vmatpush3.bf16.msra.mxu1 %v1934_v22 }
  0x28   : > { %1878 = vmatprep.subr.bf16.mxu1 %v1935_v23 }
  0x29   : > { %1847 = vmatpush3.bf16.msra.mxu0 %v1919_v11 }
  0x2b   : > { %1879 = vmatpush3.bf16.msra.mxu1 %v1935_v23 }
  0x2c   : > { %1849 = vmatmul.mubr.bf16.vlgmr.msra.gmra.mxu0 %v1921_v14 }
  0x2d   : > { %1852 = vmatprep.mubr.bf16.mxu0 %v1922_v15 }
  0x34   : > { %1853 = vmatmul.mubr.bf16.gmra.mxu0 %v1923_v16 }
  0x35   : > { %1856 = vmatprep.mubr.bf16.mxu0 %v1924_v17 }
  0x3c   : > { %1857 = vmatmul.mubr.bf16.gmra.mxu0 %v1925_v18 }
  0x3d   : > { %1860 = vmatprep.mubr.bf16.mxu0 %v1926_v19 }
  0x44   : > { %1861 = vmatmul.mubr.bf16.gmra.mxu0 %v1927_v20 }
  0xec   : > { %v1850_v24 = vpop.f32.mrf.mxu0 }
  0xed   : > { %v494_v31 = vmax.f32 %v1850_v24, 0.0 }
  0xee   : > { %v429_v25 = vpop.f32.mrf.mxu0 }
  0xef   : > { %v492_v29 = vmax.f32 %v429_v25, 0.0 }
  0xf0   : > { %v1851_v26 = vpop.f32.mrf.mxu0 }
  0xf1   : > { %v495_v27 = vmax.f32 %v1851_v26, 0.0 }
  0xf2   : > { %v432_v28 = vpop.f32.mrf.mxu0 }
  0xf3   : > { %v493_v30 = vmax.f32 %v432_v28, 0.0  ;;  %v509_v34 = vpack.c.bf16 %v495_v27, %v494_v31 }
  0xf4   : > { %v1854_v32 = vpop.f32.mrf.mxu0 }
  0xf5   : > { %v508_v33 = vpack.c.bf16 %v493_v30, %v492_v29  ;;  %v498_v37 = vmax.f32 %v1854_v32, 0.0 }
  0xf6   : > { %v445_v35 = vpop.f32.mrf.mxu0 }
  0xf7   : > { %1880 = vmatprep.mubr.bf16.mxu1 %v508_v33  ;;  %v496_v40 = vmax.f32 %v445_v35, 0.0 }
  0xf8   : > { %v1855_v36 = vpop.f32.mrf.mxu0  ;;  %1881 = vmatmul.mubr.bf16.vlgmr.msra.gmra.mxu1 %v509_v34 }
  0xf9   : > { %v499_v38 = vmax.f32 %v1855_v36, 0.0 }
  0xfa   : > { %v448_v39 = vpop.f32.mrf.mxu0 }
  0xfb   : > { %v497_v41 = vmax.f32 %v448_v39, 0.0  ;;  %v511_v44 = vpack.c.bf16 %v499_v38, %v498_v37 }
  0xfc   : > { %v1858_v42 = vpop.f32.mrf.mxu0 }
  0xfd   : > { %v510_v43 = vpack.c.bf16 %v497_v41, %v496_v40  ;;  %v502_v47 = vmax.f32 %v1858_v42, 0.0 }
  0xfe   : > { %v461_v45 = vpop.f32.mrf.mxu0 }
  0xff   : > { %1884 = vmatprep.mubr.bf16.mxu1 %v510_v43  ;;  %v500_v50 = vmax.f32 %v461_v45, 0.0 }
 0x100   : > { %v1859_v46 = vpop.f32.mrf.mxu0  ;;  %1885 = vmatmul.mubr.bf16.gmra.mxu1 %v511_v44 }
 0x101   : > { %v503_v48 = vmax.f32 %v1859_v46, 0.0 }
 0x102   : > { %v464_v49 = vpop.f32.mrf.mxu0 }
 0x103   : > { %v501_v51 = vmax.f32 %v464_v49, 0.0  ;;  %v513_v54 = vpack.c.bf16 %v503_v48, %v502_v47 }
 0x104   : > { %v1862_v52 = vpop.f32.mrf.mxu0 }
 0x105   : > { %v512_v53 = vpack.c.bf16 %v501_v51, %v500_v50  ;;  %v506_v57 = vmax.f32 %v1862_v52, 0.0 }
 0x106   : > { %v477_v55 = vpop.f32.mrf.mxu0 }
 0x107   : > { %1888 = vmatprep.mubr.bf16.mxu1 %v512_v53  ;;  %v504_v60 = vmax.f32 %v477_v55, 0.0 }
 0x108   : > { %v1863_v56 = vpop.f32.mrf.mxu0  ;;  %1889 = vmatmul.mubr.bf16.gmra.mxu1 %v513_v54 }
 0x109   : > { %v507_v58 = vmax.f32 %v1863_v56, 0.0 }
 0x10a   : > { %v480_v59 = vpop.f32.mrf.mxu0 }
 0x10b   : > { %v505_v61 = vmax.f32 %v480_v59, 0.0  ;;  %v515_v63 = vpack.c.bf16 %v507_v58, %v506_v57 }
 0x10d   : > { %v514_v62 = vpack.c.bf16 %v505_v61, %v504_v60 }
 0x10f   : > { %1892 = vmatprep.mubr.bf16.mxu1 %v514_v62 }
 0x110   : > { %1893 = vmatmul.mubr.bf16.gmra.mxu1 %v515_v63 }
 0x1b8   : > { %v2177_v2 = vpop.f32.mrf.mxu1 }
 0x1b9   : > { %v2182_v3 = vsel %vm663_vm0, %v2177_v2, -1e+30 }
 0x1ba   : > { %3343 = vst [vmem:[#allocation2_spill] sm:$0xff] %v2182_v3  ;;  %684 = vmax.xlane.f32.xlu1 %v2182_v3  ;;  %v2185_v4 = vpop.f32.mrf.mxu1  ;;  %v2568_v3 = vld [vmem:[%s2507_s8 + $0x18] sm:$0xff] }
 0x1bb   : > { %v2190_v5 = vsel %vm663_vm0, %v2185_v4, -1e+30 }
 0x1bc   : > { %680 = vmax.xlane.f32.xlu0 %v2190_v5  ;;  %v2193_v6 = vpop.f32.mrf.mxu1 }
 0x1bd   : > { %v2198_v7 = vsel %vm663_vm0, %v2193_v6, -1e+30 }
 0x1be   : > { %3344 = vst [vmem:[#allocation3_spill] sm:$0xff] %v2198_v7  ;;  %686 = vmax.xlane.f32.xlu1 %v2198_v7  ;;  %v2201_v8 = vpop.f32.mrf.mxu1 }
 0x1bf   : > { %v2206_v9 = vsel %vm663_vm0, %v2201_v8, -1e+30 }
 0x1c0   : > { %3345 = vst [vmem:[#allocation4_spill] sm:$0xff] %v2206_v9  ;;  %682 = vmax.xlane.f32.xlu0 %v2206_v9  ;;  %v2209_v10 = vpop.f32.mrf.mxu1 }
 0x1c1   : > { %v2226_v15 = vsel %vm663_vm0, %v2209_v10, -1e+30 }
 0x1c2   : > { %v2211_v11 = vpop.f32.mrf.mxu1  ;;  %3348 = vst [vmem:[#allocation7_spill] sm:$0xff] %v2226_v15 }
 0x1c3   : > { %v2216_v12 = vsel %vm663_vm0, %v2211_v11, -1e+30 }
 0x1c4   : > { %3346 = vst [vmem:[#allocation5_spill] sm:$0xff] %v2216_v12  ;;  %688 = vmax.xlane.f32.xlu0 %v2216_v12  ;;  %v2219_v13 = vpop.f32.mrf.mxu1 }
 0x1c5   : > { %3347 = vst [vmem:[#allocation6_spill] sm:$0xff] %v2219_v13  ;;  %v2242_v19 = vsel %vm663_vm0, %v2219_v13, -1e+30 }
 0x1c6   : > { %v2221_v14 = vpop.f32.mrf.mxu1  ;;  %3352 = vst [vmem:[#allocation11_spill] sm:$0xff] %v2242_v19 }
 0x1c7   : > { %v2231_v16 = vsel %vm663_vm0, %v2221_v14, -1e+30 }
 0x1c8   : > { %3349 = vst [vmem:[#allocation8_spill] sm:$0xff] %v2231_v16  ;;  %692 = vmax.xlane.f32.xlu0 %v2226_v15  ;;  %690 = vmax.xlane.f32.xlu1 %v2231_v16  ;;  %v2235_v17 = vpop.f32.mrf.mxu1 }
 0x1c9   : > { %3350 = vst [vmem:[#allocation9_spill] sm:$0xff] %v2235_v17  ;;  %v2258_v23 = vsel %vm663_vm0, %v2235_v17, -1e+30 }
 0x1ca   : > { %v2237_v18 = vpop.f32.mrf.mxu1  ;;  %3356 = vst [vmem:[#allocation15_spill] sm:$0xff] %v2258_v23 }
 0x1cb   : > { %3351 = vst [vmem:[#allocation10_spill] sm:$0xff] %v2237_v18  ;;  %v2247_v20 = vsel %vm663_vm0, %v2237_v18, -1e+30 }
 0x1cc   : > { %3353 = vst [vmem:[#allocation12_spill] sm:$0xff] %v2247_v20  ;;  %694 = vmax.xlane.f32.xlu1 %v2242_v19  ;;  %696 = vmax.xlane.f32.xlu0 %v2247_v20  ;;  %v2251_v21 = vpop.f32.mrf.mxu1 }
 0x1cd   : > { %3354 = vst [vmem:[#allocation13_spill] sm:$0xff] %v2251_v21  ;;  %v2274_v27 = vsel %vm663_vm0, %v2251_v21, -1e+30 }
 0x1ce   : > { %v2253_v22 = vpop.f32.mrf.mxu1  ;;  %3360 = vst [vmem:[#allocation19_spill] sm:$0xff] %v2274_v27 }
 0x1cf   : > { %3355 = vst [vmem:[#allocation14_spill] sm:$0xff] %v2253_v22  ;;  %v2263_v24 = vsel %vm663_vm0, %v2253_v22, -1e+30 }
 0x1d0   : > { %3357 = vst [vmem:[#allocation16_spill] sm:$0xff] %v2263_v24  ;;  %700 = vmax.xlane.f32.xlu0 %v2258_v23  ;;  %698 = vmax.xlane.f32.xlu1 %v2263_v24  ;;  %v2267_v25 = vpop.f32.mrf.mxu1 }
 0x1d1   : > { %3358 = vst [vmem:[#allocation17_spill] sm:$0xff] %v2267_v25  ;;  %v2290_v31 = vsel %vm663_vm0, %v2267_v25, -1e+30 }
 0x1d2   : > { %v2269_v26 = vpop.f32.mrf.mxu1  ;;  %3364 = vst [vmem:[#allocation23_spill] sm:$0xff] %v2290_v31 }
 0x1d3   : > { %3359 = vst [vmem:[#allocation18_spill] sm:$0xff] %v2269_v26  ;;  %v2279_v28 = vsel %vm663_vm0, %v2269_v26, -1e+30 }
 0x1d4   : > { %3361 = vst [vmem:[#allocation20_spill] sm:$0xff] %v2279_v28  ;;  %702 = vmax.xlane.f32.xlu1 %v2274_v27  ;;  %704 = vmax.xlane.f32.xlu0 %v2279_v28  ;;  %v2283_v29 = vpop.f32.mrf.mxu1 }
 0x1d5   : > { %3362 = vst [vmem:[#allocation21_spill] sm:$0xff] %v2283_v29  ;;  %v2302_v33 = vsel %vm663_vm0, %v2283_v29, -1e+30 }
 0x1d6   : > { %v2285_v30 = vpop.f32.mrf.mxu1  ;;  %3366 = vst [vmem:[#allocation25_spill] sm:$0xff] %v2302_v33 }
 0x1d7   : > { %3363 = vst [vmem:[#allocation22_spill] sm:$0xff] %v2285_v30  ;;  %v2295_v32 = vsel %vm663_vm0, %v2285_v30, -1e+30 }
 0x1d8   : > { %3365 = vst [vmem:[#allocation24_spill] sm:$0xff] %v2295_v32  ;;  %708 = vmax.xlane.f32.xlu0 %v2290_v31  ;;  %706 = vmax.xlane.f32.xlu1 %v2295_v32 }
 0x1dc   : > { %710 = vmax.xlane.f32.xlu1 %v2302_v33 }
 0x243   : > { %v2305_v34 = vpop.xlane.xlu1 %684 }
 0x244   : > { %v2309_v35 = vsub.f32 %v2177_v2, %v2305_v34 }
 0x245   : > { %v2311_v36 = vpop.xlane.xlu0 %680 }
 0x246   : > { %v2315_v37 = vsub.f32 %v2185_v4, %v2311_v36  ;;  %v730_v38 = vsel %vm663_vm0, %v2309_v35, -1e+30  ;;  %vm904_vm3 = vcmp.ge.f32.partialorder %v2190_v5, %v2311_v36 }
 0x247   : > { %v2320_v39 = vpop.xlane.xlu1 %686  ;;  %v748_v44 = vmul.f32 1.442695, %v730_v38 }
 0x248   : > { %3367 = vst [vmem:[#allocation26_spill] sm:$0xff] %v2320_v39  ;;  %v728_v40 = vsel %vm663_vm0, %v2315_v37, -1e+30  ;;  %v2327_v41 = vsub.f32 %v2193_v6, %v2320_v39  ;;  %v2524_v39 = vld [vmem:[%s2507_s8 + $0x10] sm:$0xff] }
 0x249   : > { %v744_v42 = vmul.f32 1.442695, %v728_v40  ;;  %v2329_v43 = vpop.xlane.xlu0 %682 }
 0x24a   : > { %3368 = vst [vmem:[#allocation27_spill] sm:$0xff] %v2329_v43  ;;  %v2333_v45 = vsub.f32 %v2201_v8, %v2329_v43  ;;  %v731_v46 = vsel %vm663_vm0, %v2327_v41, -1e+30 }
 0x24b   : > { %1936 = vpow2.f32 %v744_v42  ;;  %v750_v50 = vmul.f32 1.442695, %v731_v46 }
 0x24c   : > { %v729_v47 = vsel %vm663_vm0, %v2333_v45, -1e+30  ;;  %1938 = vpow2.f32 %v748_v44 }
 0x24d   : > { %v746_v48 = vmul.f32 1.442695, %v729_v47  ;;  %v2341_v49 = vpop.xlane.xlu0 %688 }
 0x24e   : > { %3369 = vst [vmem:[#allocation28_spill] sm:$0xff] %v2341_v49  ;;  %v2345_v51 = vsub.f32 %v2211_v11, %v2341_v49 }
 0x24f   : > { %1940 = vpow2.f32 %v746_v48 }
 0x250   : > { %v732_v52 = vsel %vm663_vm0, %v2345_v51, -1e+30  ;;  %1942 = vpow2.f32 %v750_v50 }
 0x251   : > { %v752_v53 = vmul.f32 1.442695, %v732_v52  ;;  %v2350_v54 = vpop.xlane.xlu0 %692  ;;  %v2352_v55 = vpop.xlane.xlu1 %690 }
 0x252   : > { %3370 = vst [vmem:[#allocation29_spill] sm:$0xff] %v2350_v54  ;;  %3371 = vst [vmem:[#allocation30_spill] sm:$0xff] %v2352_v55  ;;  %v2356_v56 = vsub.f32 %v2209_v10, %v2350_v54  ;;  %v2360_v57 = vsub.f32 %v2221_v14, %v2352_v55 }
 0x253   : > { %1944 = vpow2.f32 %v752_v53 }
 0x254   : > { %v734_v58 = vsel %vm663_vm0, %v2356_v56, -1e+30  ;;  %v733_v59 = vsel %vm663_vm0, %v2360_v57, -1e+30 }
 0x255   : > { %v756_v60 = vmul.f32 1.442695, %v734_v58  ;;  %v754_v61 = vmul.f32 1.442695, %v733_v59  ;;  %v2368_v62 = vpop.xlane.xlu1 %694  ;;  %v2370_v63 = vpop.xlane.xlu0 %696 }
 0x256   : > { %3372 = vst [vmem:[#allocation31_spill] sm:$0xff] %v2368_v62  ;;  %3373 = vst [vmem:[#allocation32_spill] sm:$0xff] %v2370_v63  ;;  %v2374_v0 = vsub.f32 %v2219_v13, %v2368_v62  ;;  %v2378_v38 = vsub.f32 %v2237_v18, %v2370_v63 }
 0x257   : > { %1946 = vpow2.f32 %v756_v60 }
 0x258   : > { %v2380_v40 = vpop.eup %1936  ;;  %1948 = vpow2.f32 %v754_v61  ;;  %v735_v42 = vsel %vm663_vm0, %v2374_v0, -1e+30  ;;  %v736_v44 = vsel %vm663_vm0, %v2378_v38, -1e+30 }
 0x259   : > { %v758_v46 = vmul.f32 1.442695, %v735_v42  ;;  %v760_v47 = vmul.f32 1.442695, %v736_v44  ;;  %v2388_v48 = vpop.xlane.xlu0 %700  ;;  %v2390_v50 = vpop.xlane.xlu1 %698  ;;  %776 = vadd.xlane.f32.xlu0 %v2380_v40 }
 0x25a   : > { %3374 = vst [vmem:[#allocation33_spill] sm:$0xff] %v2388_v48  ;;  %3375 = vst [vmem:[#allocation34_spill] sm:$0xff] %v2390_v50  ;;  %v2395_v52 = vsub.f32 %v2235_v17, %v2388_v48  ;;  %v2399_v53 = vsub.f32 %v2253_v22, %v2390_v50  ;;  %v2401_v58 = vpop.eup %1938 }
 0x25b   : > { %1950 = vpow2.f32 %v758_v46 }
 0x25c   : > { %v2403_v59 = vpop.eup %1940  ;;  %1952 = vpow2.f32 %v760_v47  ;;  %v738_v60 = vsel %vm663_vm0, %v2395_v52, -1e+30  ;;  %v737_v61 = vsel %vm663_vm0, %v2399_v53, -1e+30 }
 0x25d   : > { %v764_v42 = vmul.f32 1.442695, %v738_v60  ;;  %v762_v44 = vmul.f32 1.442695, %v737_v61  ;;  %v2411_v33 = vpop.xlane.xlu1 %702  ;;  %780 = vadd.xlane.f32.xlu0 %v2401_v58  ;;  %v2414_v31 = vpop.xlane.xlu0 %704  ;;  %778 = vadd.xlane.f32.xlu1 %v2403_v59 }
 0x25e   : > { %3376 = vst [vmem:[#allocation35_spill] sm:$0xff] %v2411_v33  ;;  %3377 = vst [vmem:[#allocation36_spill] sm:$0xff] %v2414_v31  ;;  %v2419_v46 = vsub.f32 %v2251_v21, %v2411_v33  ;;  %v2423_v47 = vsub.f32 %v2269_v26, %v2414_v31  ;;  %v2425_v32 = vpop.eup %1942 }
 0x25f   : > { %1954 = vpow2.f32 %v764_v42 }
 0x260   : > { %v2427_v60 = vpop.eup %1944  ;;  %1956 = vpow2.f32 %v762_v44  ;;  %v739_v61 = vsel %vm663_vm0, %v2419_v46, -1e+30  ;;  %v740_v28 = vsel %vm663_vm0, %v2423_v47, -1e+30 }
 0x261   : > { %v766_v27 = vmul.f32 1.442695, %v739_v61  ;;  %v768_v33 = vmul.f32 1.442695, %v740_v28  ;;  %784 = vadd.xlane.f32.xlu0 %v2427_v60  ;;  %v2436_v31 = vpop.xlane.xlu0 %708  ;;  %782 = vadd.xlane.f32.xlu1 %v2425_v32  ;;  %v2439_v42 = vpop.xlane.xlu1 %706 }
 0x262   : > { %3378 = vst [vmem:[#allocation37_spill] sm:$0xff] %v2436_v31  ;;  %3379 = vst [vmem:[#allocation38_spill] sm:$0xff] %v2439_v42  ;;  %v2443_v44 = vsub.f32 %v2267_v25, %v2436_v31  ;;  %v2447_v26 = vsub.f32 %v2285_v30, %v2439_v42 }
 0x263   : > { %1958 = vpow2.f32 %v766_v27 }
 0x264   : > { %v2449_v23 = vpop.eup %1946  ;;  %1960 = vpow2.f32 %v768_v33  ;;  %v742_v28 = vsel %vm663_vm0, %v2443_v44, -1e+30  ;;  %v741_v61 = vsel %vm663_vm0, %v2447_v26, -1e+30 }
 0x265   : > { %v2457_v48 = vpop.eup %1948  ;;  %v772_v25 = vmul.f32 1.442695, %v742_v28  ;;  %v770_v31 = vmul.f32 1.442695, %v741_v61  ;;  %788 = vadd.xlane.f32.xlu0 %v2449_v23  ;;  %v2460_v42 = vpop.xlane.xlu1 %710 }
 0x266   : > { %3380 = vst [vmem:[#allocation39_spill] sm:$0xff] %v2460_v42  ;;  %786 = vadd.xlane.f32.xlu1 %v2457_v48  ;;  %v2465_v27 = vsub.f32 %v2283_v29, %v2460_v42 }
 0x267   : > { %1962 = vpow2.f32 %v772_v25 }
 0x268   : > { %v2467_v33 = vpop.eup %1950  ;;  %1964 = vpow2.f32 %v770_v31  ;;  %v743_v30 = vsel %vm663_vm0, %v2465_v27, -1e+30 }
 0x269   : > { %v2472_v28 = vpop.eup %1952  ;;  %v774_v61 = vmul.f32 1.442695, %v743_v30 }
 0x26a   : > { %792 = vadd.xlane.f32.xlu0 %v2472_v28  ;;  %790 = vadd.xlane.f32.xlu1 %v2467_v33 }
 0x26b   : > { %1966 = vpow2.f32 %v774_v61 }
 0x26c   : > { %v2476_v21 = vpop.eup %1954 }
 0x26d   : > { %v2478_v29 = vpop.eup %1956 }
 0x26e   : > { %796 = vadd.xlane.f32.xlu0 %v2476_v21  ;;  %794 = vadd.xlane.f32.xlu1 %v2478_v29 }
 0x270   : > { %v2482_v25 = vpop.eup %1958 }
 0x271   : > { %v2484_v31 = vpop.eup %1960 }
 0x272   : > { %800 = vadd.xlane.f32.xlu0 %v2484_v31  ;;  %798 = vadd.xlane.f32.xlu1 %v2482_v25 }
 0x274   : > { %v2488_v30 = vpop.eup %1962 }
 0x275   : > { %v2490_v42 = vpop.eup %1964 }
 0x276   : > { %804 = vadd.xlane.f32.xlu0 %v2488_v30  ;;  %802 = vadd.xlane.f32.xlu1 %v2490_v42 }
 0x278   : > { %v2494_v61 = vpop.eup %1966 }
 0x27a   : > { %806 = vadd.xlane.f32.xlu1 %v2494_v61 }
 0x2e2   : > { %v777_v24 = vpop.xlane.xlu0 %776 }
 0x2e3   : > { %1968 = vlog2.f32 %v777_v24 }
 0x2e4   : > { %1970 = vrcp.f32 %v777_v24 }
 0x2e6   : > { %v781_v50 = vpop.xlane.xlu0 %780  ;;  %v779_v20 = vpop.xlane.xlu1 %778 }
 0x2e7   : > { %1972 = vlog2.f32 %v781_v50 }
 0x2e8   : > { %1974 = vrcp.f32 %v781_v50  ;;  %v2072_v50 = vmov 0.0  }
 0x2e9   : > { %1976 = vlog2.f32 %v779_v20  ;;  %v2499_v54 = vsel %vm1233_vm1, -1.0, %v2072_v50 }
 0x2ea   : > { %1978 = vrcp.f32 %v779_v20  ;;  %v785_v63 = vpop.xlane.xlu0 %784  ;;  %v783_v17 = vpop.xlane.xlu1 %782 }
 0x2eb   : > { %1980 = vlog2.f32 %v785_v63 }
 0x2ec   : > { %1982 = vlog2.f32 %v783_v17 }
 0x2ed   : > { %1984 = vrcp.f32 %v783_v17 }
 0x2ee   : > { %v789_v19 = vpop.xlane.xlu0 %788 }
 0x2ef   : > { %1986 = vlog2.f32 %v789_v19  ;;  %v787_v62 = vpop.xlane.xlu1 %786 }
 0x2f0   : > { %v1969_v15 = vpop.eup %1968  ;;  %1988 = vrcp.f32 %v785_v63  ;;  %v2510_v63 = vld [vmem:[%s2507_s8] sm:$0xff] }
 0x2f1   : > { %v809_v24 = vmul.f32 0.6931472, %v1969_v15  ;;  %1990 = vlog2.f32 %v787_v62  ;;  %v1971_v20 = vpop.eup %1970 }
 0x2f2   : > { %1992 = vrcp.f32 %v789_v19  ;;  %v2518_v50 = vmul.f32 %v1971_v20, %v2380_v40 }
 0x2f3   : > { %1994 = vrcp.f32 %v787_v62  ;;  %v793_v16 = vpop.xlane.xlu0 %792  ;;  %v791_v55 = vpop.xlane.xlu1 %790  ;;  %v840_v17 = vsub.f32 %v2315_v37, %v809_v24 }
 0x2f4   : > { %v1973_v12 = vpop.eup %1972  ;;  %1996 = vlog2.f32 %v793_v16  ;;  %3381 = vst [vmem:[#allocation40_spill] sm:$0xff] %v2518_v50 }
 0x2f5   : > { %v1975_v15 = vpop.eup %1974  ;;  %v813_v19 = vmul.f32 0.6931472, %v1973_v12  ;;  %1998 = vrcp.f32 %v793_v16  ;;  %v1235_v62 = vsel %vm663_vm0, %v840_v17, %v2499_v54  ;;  %v856_v37 = vsel %vm663_vm0, %v840_v17, 0.0 }
 0x2f6   : > { %v1977_v24 = vpop.eup %1976  ;;  %2000 = vlog2.f32 %v791_v55  ;;  %v1251_v49 = vmul.f32 %v1235_v62, %v2510_v63  ;;  %v1532_v17 = vmul.f32 %v2518_v50, %v856_v37 }
 0x2f7   : > { %v1979_v22 = vpop.eup %1978  ;;  %v811_v12 = vmul.f32 0.6931472, %v1977_v24  ;;  %2002 = vrcp.f32 %v791_v55  ;;  %v797_v16 = vpop.xlane.xlu0 %796  ;;  %v842_v9 = vsub.f32 %v2309_v35, %v813_v19  ;;  %v2532_v35 = vmul.f32 %v1975_v15, %v2401_v58  ;;  %v2542_v15 = vld [vmem:[%s2507_s8 + $0x8] sm:$0xff] }
 0x2f8   : > { %v795_v18 = vpop.xlane.xlu1 %794  ;;  %v1981_v43 = vpop.eup %1980  ;;  %2004 = vlog2.f32 %v797_v16  ;;  %1267 = vadd.xlane.f32.xlu0 %v1251_v49 }
 0x2f9   : > { %v817_v7 = vmul.f32 0.6931472, %v1981_v43  ;;  %2006 = vrcp.f32 %v797_v16  ;;  %v1237_v40 = vsel %vm663_vm0, %v842_v9, %v2499_v54  ;;  %v858_v55 = vsel %vm663_vm0, %v842_v9, 0.0  ;;  %v1983_v20 = vpop.eup %1982  ;;  %3382 = vst [vmem:[#allocation41_spill] sm:$0xff] %v2532_v35 }
 0x2fa   : > { %2008 = vlog2.f32 %v795_v18  ;;  %v1253_v49 = vmul.f32 %v1237_v40, %v2524_v39  ;;  %v841_v43 = vsub.f32 %v2333_v45, %v811_v12  ;;  %v1985_v19 = vpop.eup %1984  ;;  %v815_v62 = vmul.f32 0.6931472, %v1983_v20 }
 0x2fb   : > { %2010 = vrcp.f32 %v795_v18  ;;  %v801_v37 = vpop.xlane.xlu0 %800  ;;  %v2537_v16 = vmul.f32 %v1979_v22, %v2403_v59  ;;  %v844_v9 = vsub.f32 %v2345_v51, %v817_v7  ;;  %v1534_v58 = vmul.f32 %v2532_v35, %v858_v55  ;;  %v2555_v55 = vld [vmem:[%s2507_s8 + $0x20] sm:$0xff] }
 0x2fc   : > { %v799_v24 = vpop.xlane.xlu1 %798  ;;  %v1987_v50 = vpop.eup %1986  ;;  %2012 = vlog2.f32 %v801_v37  ;;  %1271 = vadd.xlane.f32.xlu0 %v1253_v49  ;;  %v1236_v45 = vsel %vm663_vm0, %v841_v43, %v2499_v54  ;;  %v857_v18 = vsel %vm663_vm0, %v841_v43, 0.0  ;;  %v2552_v51 = vmul.f32 %v1985_v19, %v2425_v32 }
 0x2fd   : > { %3383 = vst [vmem:[#allocation42_spill] sm:$0xff] %v2537_v16  ;;  %v1989_v12 = vpop.eup %1988  ;;  %v821_v22 = vmul.f32 0.6931472, %v1987_v50  ;;  %v1252_v59 = vmul.f32 %v1236_v45, %v2542_v15  ;;  %v1533_v7 = vmul.f32 %v2537_v16, %v857_v18  ;;  %2014 = vlog2.f32 %v799_v24 }
 0x2fe   : > { %3384 = vst [vmem:[#allocation43_spill] sm:$0xff] %v2552_v51  ;;  %v1991_v40 = vpop.eup %1990  ;;  %v1239_v20 = vsel %vm663_vm0, %v844_v9, %v2499_v54  ;;  %v860_v49 = vsel %vm663_vm0, %v844_v9, 0.0  ;;  %v843_v50 = vsub.f32 %v2327_v41, %v815_v62  ;;  %2016 = vrcp.f32 %v799_v24 }
 0x2ff   : > { %v1993_v43 = vpop.eup %1992  ;;  %v819_v45 = vmul.f32 0.6931472, %v1991_v40  ;;  %1269 = vadd.xlane.f32.xlu1 %v1252_v59  ;;  %v1548_v32 = vadd.f32 %v1533_v7, %v1532_v17  ;;  %v805_v19 = vpop.xlane.xlu0 %804  ;;  %v1255_v16 = vmul.f32 %v1239_v20, %v2555_v55  ;;  %v2565_v13 = vmul.f32 %v1989_v12, %v2427_v60 }
 0x300   : > { %v803_v18 = vpop.xlane.xlu1 %802  ;;  %v1995_v35 = vpop.eup %1994  ;;  %2018 = vlog2.f32 %v805_v19  ;;  %v1238_v41 = vsel %vm663_vm0, %v843_v50, %v2499_v54  ;;  %v859_v62 = vsel %vm663_vm0, %v843_v50, 0.0  ;;  %v846_v7 = vsub.f32 %v2356_v56, %v821_v22 }
 0x301   : > { %v1997_v24 = vpop.eup %1996  ;;  %2020 = vrcp.f32 %v801_v37  ;;  %1275 = vadd.xlane.f32.xlu0 %v1255_v16  ;;  %v1254_v17 = vmul.f32 %v1238_v41, %v2568_v3  ;;  %v1549_v9 = vadd.f32 %v1548_v32, %v1534_v58  ;;  %v1535_v59 = vmul.f32 %v2552_v51, %v859_v62  ;;  %v2581_v32 = vld [vmem:[%s2507_s8 + $0x30] sm:$0xff] }
 0x302   : > { %v1999_v60 = vpop.eup %1998  ;;  %2022 = vlog2.f32 %v803_v18  ;;  %v1536_v12 = vmul.f32 %v2565_v13, %v860_v49  ;;  %v825_v20 = vmul.f32 0.6931472, %v1997_v24  ;;  %v845_v16 = vsub.f32 %v2360_v57, %v819_v45  ;;  %v2593_v24 = vld [vmem:[%s2507_s8 + $0x28] sm:$0xff] }
 0x303   : > { %v2001_v40 = vpop.eup %2000  ;;  %2024 = vrcp.f32 %v803_v18  ;;  %1273 = vadd.xlane.f32.xlu1 %v1254_v17  ;;  %v1550_v50 = vadd.f32 %v1549_v9, %v1535_v59  ;;  %v2584_v62 = vmul.f32 %v1993_v43, %v2449_v23  ;;  %v1241_v56 = vsel %vm663_vm0, %v846_v7, %v2499_v54 }
 0x304   : > { %v807_v37 = vpop.xlane.xlu1 %806  ;;  %v2003_v41 = vpop.eup %2002  ;;  %v823_v58 = vmul.f32 0.6931472, %v2001_v40  ;;  %v1257_v49 = vmul.f32 %v1241_v56, %v2581_v32  ;;  %v862_v18 = vsel %vm663_vm0, %v846_v7, 0.0  ;;  %v2596_v57 = vmul.f32 %v1995_v35, %v2457_v48 }
 0x305   : > { %2026 = vlog2.f32 %v807_v37  ;;  %v2005_v22 = vpop.eup %2004  ;;  %v1240_v23 = vsel %vm663_vm0, %v845_v16, %v2499_v54  ;;  %v1551_v9 = vadd.f32 %v1550_v50, %v1536_v12  ;;  %v861_v59 = vsel %vm663_vm0, %v845_v16, 0.0 }
 0x306   : > { %v2007_v43 = vpop.eup %2006  ;;  %v829_v45 = vmul.f32 0.6931472, %v2005_v22  ;;  %v1256_v17 = vmul.f32 %v1240_v23, %v2593_v24  ;;  %2028 = vrcp.f32 %v805_v19  ;;  %1279 = vadd.xlane.f32.xlu0 %v1257_v49  ;;  %v1537_v48 = vmul.f32 %v2596_v57, %v861_v59  ;;  %v2610_v23 = vld [vmem:[%s2507_s8 + $0x40] sm:$0xff] }
 0x307   : > { %v2009_v40 = vpop.eup %2008  ;;  %v848_v35 = vsub.f32 %v2378_v38, %v825_v20  ;;  %v847_v7 = vsub.f32 %v2374_v0, %v823_v58  ;;  %2030 = vrcp.f32 %v807_v37  ;;  %v1538_v22 = vmul.f32 %v2584_v62, %v862_v18  ;;  %v2616_v38 = vld [vmem:[%s2507_s8 + $0x38] sm:$0xff] }
 0x308   : > { %v2011_v56 = vpop.eup %2010  ;;  %v827_v51 = vmul.f32 0.6931472, %v2009_v40  ;;  %1277 = vadd.xlane.f32.xlu1 %v1256_v17  ;;  %v850_v12 = vsub.f32 %v2395_v52, %v829_v45  ;;  %v1552_v16 = vadd.f32 %v1551_v9, %v1537_v48  ;;  %v2619_v0 = vmul.f32 %v2003_v41, %v2467_v33  ;;  %v2634_v41 = vld [vmem:[%s2507_s8 + $0x50] sm:$0xff] }
 0x309   : > { %v2013_v50 = vpop.eup %2012  ;;  %v1243_v19 = vsel %vm663_vm0, %v848_v35, %v2499_v54  ;;  %v1242_v20 = vsel %vm663_vm0, %v847_v7, %v2499_v54  ;;  %v864_v58 = vsel %vm663_vm0, %v848_v35, 0.0  ;;  %v2629_v45 = vmul.f32 %v1999_v60, %v2472_v28 }
 0x30a   : > { %3385 = vst [vmem:[#allocation44_spill] sm:$0xff] %v2619_v0  ;;  %v833_v37 = vmul.f32 0.6931472, %v2013_v50  ;;  %v1259_v52 = vmul.f32 %v1243_v19, %v2610_v23  ;;  %v1258_v49 = vmul.f32 %v1242_v20, %v2616_v38  ;;  %v2015_v18 = vpop.eup %2014  ;;  %v1553_v17 = vadd.f32 %v1552_v16, %v1538_v22 }
 0x30b   : > { %v863_v33 = vsel %vm663_vm0, %v847_v7, 0.0  ;;  %v1245_v9 = vsel %vm663_vm0, %v850_v12, %v2499_v54  ;;  %v2017_v59 = vpop.eup %2016  ;;  %v831_v40 = vmul.f32 0.6931472, %v2015_v18  ;;  %v2641_v28 = vmul.f32 %v2007_v43, %v2476_v21  ;;  %v2654_v18 = vld [vmem:[%s2507_s8 + $0x48] sm:$0xff] }
 0x30c   : > { %1283 = vadd.xlane.f32.xlu0 %v1259_v52  ;;  %1281 = vadd.xlane.f32.xlu1 %v1258_v49  ;;  %v1539_v48 = vmul.f32 %v2619_v0, %v863_v33  ;;  %v1261_v60 = vmul.f32 %v1245_v9, %v2634_v41  ;;  %v1540_v7 = vmul.f32 %v2629_v45, %v864_v58  ;;  %v866_v22 = vsel %vm663_vm0, %v850_v12, 0.0 }
 0x30d   : > { %3386 = vst [vmem:[#allocation45_spill] sm:$0xff] %v2641_v28  ;;  %v2019_v35 = vpop.eup %2018  ;;  %v849_v50 = vsub.f32 %v2399_v53, %v827_v51  ;;  %v852_v16 = vsub.f32 %v2423_v47, %v833_v37  ;;  %v2650_v49 = vmul.f32 %v2011_v56, %v2478_v29  ;;  %v851_v21 = vsub.f32 %v2419_v46, %v831_v40  ;;  %v2674_v40 = vld [vmem:[%s2507_s8 + $0x58] sm:$0xff] }
 0x30e   : > { %v2021_v19 = vpop.eup %2020  ;;  %v837_v20 = vmul.f32 0.6931472, %v2019_v35  ;;  %v1554_v52 = vadd.f32 %v1553_v17, %v1539_v48  ;;  %v2665_v29 = vmul.f32 %v2017_v59, %v2482_v25  ;;  %v2670_v17 = vld [vmem:[%s2507_s8 + $0x60] sm:$0xff] }
 0x30f   : > { %3387 = vst [vmem:[#allocation46_spill] sm:$0xff] %v2650_v49  ;;  %v2023_v43 = vpop.eup %2022  ;;  %v1244_v12 = vsel %vm663_vm0, %v849_v50, %v2499_v54  ;;  %v865_v53 = vsel %vm663_vm0, %v849_v50, 0.0  ;;  %v1247_v47 = vsel %vm663_vm0, %v852_v16, %v2499_v54  ;;  %v1246_v25 = vsel %vm663_vm0, %v851_v21, %v2499_v54 }
 0x310   : > { %3388 = vst [vmem:[#allocation47_spill] sm:$0xff] %v2665_v29  ;;  %v2025_v51 = vpop.eup %2024  ;;  %v835_v46 = vmul.f32 0.6931472, %v2023_v43  ;;  %1287 = vadd.xlane.f32.xlu0 %v1261_v60  ;;  %v1260_v56 = vmul.f32 %v1244_v12, %v2654_v18  ;;  %v1555_v37 = vadd.f32 %v1554_v52, %v1540_v7  ;;  %v1541_v58 = vmul.f32 %v2650_v49, %v865_v53  ;;  %v2686_v43 = vld [vmem:[%s2507_s8 + $0x70] sm:$0xff] }
 0x311   : > { %v1263_v9 = vmul.f32 %v1247_v47, %v2670_v17  ;;  %v867_v59 = vsel %vm663_vm0, %v851_v21, 0.0  ;;  %v854_v48 = vsub.f32 %v2443_v44, %v837_v20  ;;  %v1262_v7 = vmul.f32 %v1246_v25, %v2674_v40 }
 0x312   : > { %v2027_v33 = vpop.eup %2026  ;;  %1285 = vadd.xlane.f32.xlu1 %v1260_v56  ;;  %v1556_v35 = vadd.f32 %v1555_v37, %v1541_v58  ;;  %v1542_v50 = vmul.f32 %v2641_v28, %v866_v22  ;;  %v1543_v52 = vmul.f32 %v2665_v29, %v867_v59  ;;  %v853_v21 = vsub.f32 %v2447_v26, %v835_v46  ;;  %v2700_v37 = vld [vmem:[%s2507_s8 + $0x68] sm:$0xff] }
 0x313   : > { %v839_v60 = vmul.f32 0.6931472, %v2027_v33  ;;  %v1249_v12 = vsel %vm663_vm0, %v854_v48, %v2499_v54  ;;  %v2029_v53 = vpop.eup %2028  ;;  %v868_v44 = vsel %vm663_vm0, %v852_v16, 0.0  ;;  %v2697_v22 = vmul.f32 %v2021_v19, %v2484_v31 }
 0x314   : > { %1291 = vadd.xlane.f32.xlu0 %v1263_v9  ;;  %v1265_v20 = vmul.f32 %v1249_v12, %v2686_v43  ;;  %v2031_v56 = vpop.eup %2030  ;;  %v1248_v26 = vsel %vm663_vm0, %v853_v21, %v2499_v54  ;;  %v869_v46 = vsel %vm663_vm0, %v853_v21, 0.0  ;;  %v2708_v16 = vmul.f32 %v2025_v51, %v2490_v42  ;;  %v2721_v51 = vld [vmem:[%s2507_s8 + $0x78] sm:$0xff] }
 0x315   : > { %v855_v47 = vsub.f32 %v2465_v27, %v839_v60  ;;  %3389 = vst [vmem:[#allocation48_spill] sm:$0xff] %v2697_v22  ;;  %v1557_v58 = vadd.f32 %v1556_v35, %v1542_v50  ;;  %v1264_v27 = vmul.f32 %v1248_v26, %v2700_v37  ;;  %v1544_v19 = vmul.f32 %v2697_v22, %v868_v44 }
 0x316   : > { %3390 = vst [vmem:[#allocation49_spill] sm:$0xff] %v2708_v16  ;;  %1289 = vadd.xlane.f32.xlu1 %v1262_v7  ;;  %v1545_v33 = vmul.f32 %v2708_v16, %v869_v46  ;;  %v870_v25 = vsel %vm663_vm0, %v854_v48, 0.0  ;;  %v2724_v59 = vmul.f32 %v2029_v53, %v2488_v30  ;;  %v2727_v60 = vmul.f32 %v2031_v56, %v2494_v61 }
 0x317   : > { %v1250_v31 = vsel %vm663_vm0, %v855_v47, %v2499_v54  ;;  %v1558_v9 = vadd.f32 %v1557_v58, %v1543_v52  ;;  %v871_v42 = vsel %vm663_vm0, %v855_v47, 0.0 }
 0x318   : > { %1295 = vadd.xlane.f32.xlu0 %v1265_v20  ;;  %3391 = vst [vmem:[#allocation50_spill] sm:$0xff] %v2724_v59  ;;  %3392 = vst [vmem:[#allocation51_spill] sm:$0xff] %v2727_v60  ;;  %v1266_v35 = vmul.f32 %v1250_v31, %v2721_v51  ;;  %v1546_v7 = vmul.f32 %v2724_v59, %v870_v25  ;;  %v1547_v50 = vmul.f32 %v2727_v60, %v871_v42 }
 0x319   : > { %v1559_v54 = vadd.f32 %v1558_v9, %v1544_v19 }
 0x31a   : > { %1293 = vadd.xlane.f32.xlu1 %v1264_v27 }
 0x31b   : > { %v1560_v48 = vadd.f32 %v1559_v54, %v1545_v33 }
 0x31d   : > { %v1561_v52 = vadd.f32 %v1560_v48, %v1546_v7 }
 0x31e   : > { %1297 = vadd.xlane.f32.xlu1 %v1266_v35 }
 0x31f   : > { %v2732_v12 = vadd.f32 %v1561_v52, %v1547_v50 }
 0x381   : > { %v1268_v21 = vpop.xlane.xlu0 %1267 }
 0x382   : > { %v1299_v44 = vmul.f32 1.442695, %v1268_v21 }
 0x384   : > { %2032 = vpow2.f32 %v1299_v44 }
 0x385   : > { %v1272_v30 = vpop.xlane.xlu0 %1271 }
 0x386   : > { %v1303_v53 = vmul.f32 1.442695, %v1272_v30 }
 0x388   : > { %2034 = vpow2.f32 %v1303_v53  ;;  %v1270_v61 = vpop.xlane.xlu1 %1269 }
 0x389   : > { %v1301_v20 = vmul.f32 1.442695, %v1270_v61 }
 0x38a   : > { %v1276_v47 = vpop.xlane.xlu0 %1275 }
 0x38b   : > { %2036 = vpow2.f32 %v1301_v20  ;;  %v1307_v56 = vmul.f32 1.442695, %v1276_v47 }
 0x38c   : > { %v1274_v26 = vpop.xlane.xlu1 %1273 }
 0x38d   : > { %2038 = vpow2.f32 %v1307_v56  ;;  %v1305_v46 = vmul.f32 1.442695, %v1274_v26 }
 0x38f   : > { %2040 = vpow2.f32 %v1305_v46  ;;  %v1280_v58 = vpop.xlane.xlu0 %1279 }
 0x390   : > { %v1311_v31 = vmul.f32 1.442695, %v1280_v58 }
 0x391   : > { %v2033_v27 = vpop.eup %2032  ;;  %v1278_v19 = vpop.xlane.xlu1 %1277 }
 0x392   : > { %v1309_v33 = vmul.f32 1.442695, %v1278_v19  ;;  %v1347_v9 = vmax.f32 %v2033_v27, 0.9  ;;  %2042 = vpow2.f32 %v1311_v31  ;;  %v1331_v48 = vmul.f32 %v2033_v27, %v2510_v63 }
 0x394   : > { %2044 = vpow2.f32 %v1309_v33  ;;  %v1363_v25 = vmin.f32 %v1347_v9, 1.1 }
 0x395   : > { %v2035_v42 = vpop.eup %2034  ;;  %v1284_v54 = vpop.xlane.xlu0 %1283 }
 0x396   : > { %v1282_v35 = vpop.xlane.xlu1 %1281  ;;  %v1315_v7 = vmul.f32 1.442695, %v1284_v54  ;;  %v1379_v52 = vmul.f32 %v1363_v25, %v2510_v63  ;;  %v1349_v21 = vmax.f32 %v2035_v42, 0.9  ;;  %v1333_v58 = vmul.f32 %v2035_v42, %v2524_v39 }
 0x397   : > { %v1313_v50 = vmul.f32 1.442695, %v1282_v35 }
 0x398   : > { %v2037_v44 = vpop.eup %2036  ;;  %2046 = vpow2.f32 %v1315_v7  ;;  %v1395_v30 = vmin.f32 %v1331_v48, %v1379_v52  ;;  %v1365_v61 = vmin.f32 %v1349_v21, 1.1 }
 0x399   : > { %2048 = vpow2.f32 %v1313_v50  ;;  %v1288_v53 = vpop.xlane.xlu0 %1287  ;;  %v1348_v20 = vmax.f32 %v2037_v44, 0.9  ;;  %v1332_v35 = vmul.f32 %v2037_v44, %v2542_v15 }
 0x39a   : > { %v2039_v47 = vpop.eup %2038  ;;  %v1319_v56 = vmul.f32 1.442695, %v1288_v53  ;;  %v1411_v26 = vsub.f32 0.0, %v1395_v30  ;;  %v1381_v31 = vmul.f32 %v1365_v61, %v2524_v39 }
 0x39b   : > { %v1286_v46 = vpop.xlane.xlu1 %1285  ;;  %v1364_v19 = vmin.f32 %v1348_v20, 1.1  ;;  %v1351_v9 = vmax.f32 %v2039_v47, 0.9 }
 0x39c   : > { %v2041_v27 = vpop.eup %2040  ;;  %2050 = vpow2.f32 %v1319_v56  ;;  %v1317_v33 = vmul.f32 1.442695, %v1286_v46  ;;  %1443 = vrot.lane.b32.xlu0 %v1411_v26, %s2073_s9  ;;  %v1397_v54 = vmin.f32 %v1333_v58, %v1381_v31 }
 0x39d   : > { %v1292_v25 = vpop.xlane.xlu0 %1291  ;;  %v1380_v7 = vmul.f32 %v1364_v19, %v2542_v15  ;;  %v1350_v50 = vmax.f32 %v2041_v27, 0.9  ;;  %v1367_v20 = vmin.f32 %v1351_v9, 1.1  ;;  %v1334_v44 = vmul.f32 %v2041_v27, %v2568_v3 }
 0x39e   : > { %2052 = vpow2.f32 %v1317_v33  ;;  %v1323_v48 = vmul.f32 1.442695, %v1292_v25  ;;  %v1413_v52 = vsub.f32 0.0, %v1397_v54 }
 0x39f   : > { %v1290_v42 = vpop.xlane.xlu1 %1289  ;;  %v1396_v21 = vmin.f32 %v1332_v35, %v1380_v7  ;;  %v1366_v30 = vmin.f32 %v1350_v50, 1.1  ;;  %v2043_v53 = vpop.eup %2042  ;;  %v1383_v9 = vmul.f32 %v1367_v20, %v2555_v55 }
 0x3a0   : > { %2054 = vpow2.f32 %v1323_v48  ;;  %v1321_v61 = vmul.f32 1.442695, %v1290_v42  ;;  %1447 = vrot.lane.b32.xlu1 %v1413_v52, %s2073_s9  ;;  %v1353_v46 = vmax.f32 %v2043_v53, 0.9  ;;  %v1337_v48 = vmul.f32 %v2043_v53, %v2581_v32 }
 0x3a1   : > { %v2045_v56 = vpop.eup %2044  ;;  %v1296_v26 = vpop.xlane.xlu0 %1295  ;;  %v1382_v58 = vmul.f32 %v1366_v30, %v2568_v3  ;;  %v1412_v33 = vsub.f32 0.0, %v1396_v21  ;;  %v1335_v30 = vmul.f32 %v2039_v47, %v2555_v55 }
 0x3a2   : > { %2056 = vpow2.f32 %v1321_v61  ;;  %v1327_v31 = vmul.f32 1.442695, %v1296_v26  ;;  %v1369_v25 = vmin.f32 %v1353_v46, 1.1  ;;  %v1352_v35 = vmax.f32 %v2045_v56, 0.9 }
 0x3a3   : > { %v1294_v19 = vpop.xlane.xlu1 %1293  ;;  %v1398_v54 = vmin.f32 %v1334_v44, %v1382_v58  ;;  %v1336_v21 = vmul.f32 %v2045_v56, %v2593_v24 }
 0x3a4   : > { %2058 = vpow2.f32 %v1327_v31  ;;  %v1325_v7 = vmul.f32 1.442695, %v1294_v19  ;;  %1445 = vrot.lane.b32.xlu1 %v1412_v33, %s2073_s9  ;;  %v1385_v27 = vmul.f32 %v1369_v25, %v2581_v32  ;;  %v1368_v42 = vmin.f32 %v1352_v35, 1.1 }
 0x3a5   : > { %v2047_v50 = vpop.eup %2046  ;;  %v1414_v44 = vsub.f32 0.0, %v1398_v54  ;;  %v1399_v19 = vmin.f32 %v1335_v30, %v1383_v9 }
 0x3a6   : > { %v2049_v52 = vpop.eup %2048  ;;  %2060 = vpow2.f32 %v1325_v7  ;;  %v1355_v61 = vmax.f32 %v2047_v50, 0.9  ;;  %v1401_v46 = vmin.f32 %v1337_v48, %v1385_v27  ;;  %v1384_v20 = vmul.f32 %v1368_v42, %v2593_v24 }
 0x3a7   : > { %v1298_v26 = vpop.xlane.xlu1 %1297  ;;  %v1354_v58 = vmax.f32 %v2049_v52, 0.9  ;;  %v1338_v54 = vmul.f32 %v2049_v52, %v2616_v38  ;;  %v1415_v30 = vsub.f32 0.0, %v1399_v19 }
 0x3a8   : > { %v1329_v31 = vmul.f32 1.442695, %v1298_v26  ;;  %v1417_v53 = vsub.f32 0.0, %v1401_v46  ;;  %1449 = vrot.lane.b32.xlu1 %v1414_v44, %s2073_s9  ;;  %v1400_v25 = vmin.f32 %v1336_v21, %v1384_v20  ;;  %v1371_v7 = vmin.f32 %v1355_v61, 1.1 }
 0x3a9   : > { %v2051_v33 = vpop.eup %2050  ;;  %v1370_v35 = vmin.f32 %v1354_v58, 1.1  ;;  %v1339_v58 = vmul.f32 %v2047_v50, %v2610_v23 }
 0x3aa   : > { %2062 = vpow2.f32 %v1329_v31  ;;  %v1357_v47 = vmax.f32 %v2051_v33, 0.9  ;;  %1455 = vrot.lane.b32.xlu0 %v1417_v53, %s2073_s9  ;;  %v1416_v56 = vsub.f32 0.0, %v1400_v25  ;;  %v1387_v21 = vmul.f32 %v1371_v7, %v2610_v23 }
 0x3ab   : > { %v2053_v60 = vpop.eup %2052  ;;  %v1386_v48 = vmul.f32 %v1370_v35, %v2616_v38  ;;  %v1341_v61 = vmul.f32 %v2051_v33, %v2634_v41 }
 0x3ac   : > { %v1373_v27 = vmin.f32 %v1357_v47, 1.1  ;;  %v1356_v42 = vmax.f32 %v2053_v60, 0.9  ;;  %1453 = vrot.lane.b32.xlu1 %v1416_v56, %s2073_s9  ;;  %v1340_v19 = vmul.f32 %v2053_v60, %v2654_v18  ;;  %v1403_v33 = vmin.f32 %v1339_v58, %v1387_v21 }
 0x3ad   : > { %v2055_v9 = vpop.eup %2054  ;;  %v1402_v26 = vmin.f32 %v1338_v54, %v1386_v48 }
 0x3ae   : > { %v1389_v46 = vmul.f32 %v1373_v27, %v2634_v41  ;;  %v1372_v44 = vmin.f32 %v1356_v42, 1.1  ;;  %1451 = vrot.lane.b32.xlu0 %v1415_v30, %s2073_s9  ;;  %v1359_v31 = vmax.f32 %v2055_v9, 0.9 }
 0x3af   : > { %v2057_v20 = vpop.eup %2056  ;;  %v1418_v52 = vsub.f32 0.0, %v1402_v26 }
 0x3b0   : > { %v1405_v53 = vmin.f32 %v1341_v61, %v1389_v46  ;;  %v1388_v25 = vmul.f32 %v1372_v44, %v2654_v18  ;;  %v1358_v35 = vmax.f32 %v2057_v20, 0.9  ;;  %v1375_v48 = vmin.f32 %v1359_v31, 1.1 }
 0x3b1   : > { %v2059_v47 = vpop.eup %2058  ;;  %1457 = vrot.lane.b32.xlu1 %v1418_v52, %s2073_s9  ;;  %v1419_v61 = vsub.f32 0.0, %v1403_v33  ;;  %v1342_v60 = vmul.f32 %v2057_v20, %v2674_v40 }
 0x3b2   : > { %v1421_v7 = vsub.f32 0.0, %v1405_v53  ;;  %v1404_v56 = vmin.f32 %v1340_v19, %v1388_v25  ;;  %v1361_v54 = vmax.f32 %v2059_v47, 0.9  ;;  %v1374_v42 = vmin.f32 %v1358_v35, 1.1 }
 0x3b3   : > { %v2061_v27 = vpop.eup %2060  ;;  %v1345_v21 = vmul.f32 %v2059_v47, %v2686_v43  ;;  %v1391_v52 = vmul.f32 %v1375_v48, %v2670_v17  ;;  %v1343_v19 = vmul.f32 %v2055_v9, %v2670_v17 }
 0x3b4   : > { %1463 = vrot.lane.b32.xlu0 %v1421_v7, %s2073_s9  ;;  %v1420_v50 = vsub.f32 0.0, %v1404_v56  ;;  %v1377_v30 = vmin.f32 %v1361_v54, 1.1  ;;  %v1360_v26 = vmax.f32 %v2061_v27, 0.9  ;;  %v1390_v46 = vmul.f32 %v1374_v42, %v2674_v40 }
 0x3b5   : > { %v1344_v20 = vmul.f32 %v2061_v27, %v2700_v37  ;;  %v1407_v47 = vmin.f32 %v1343_v19, %v1391_v52  ;;  %v1165_v19 = vsub.f32 %v2211_v11, %v2555_v55  ;;  %v1167_v55 = vsub.f32 %v2209_v10, %v2581_v32 }
 0x3b6   : > { %1461 = vrot.lane.b32.xlu1 %v1420_v50, %s2073_s9  ;;  %v1393_v44 = vmul.f32 %v1377_v30, %v2686_v43  ;;  %v1376_v58 = vmin.f32 %v1360_v26, 1.1  ;;  %v1406_v53 = vmin.f32 %v1342_v60, %v1390_v46  ;;  %v1162_v50 = vsub.f32 %v2201_v8, %v2542_v15 }
 0x3b7   : > { %v2063_v31 = vpop.eup %2062  ;;  %v1423_v30 = vsub.f32 0.0, %v1407_v47  ;;  %v1163_v15 = vsub.f32 %v2177_v2, %v2524_v39  ;;  %v1166_v39 = vsub.f32 %v2221_v14, %v2593_v24  ;;  %v3393_v24 = vld [vmem:[#allocation2_spill] sm:$0xff] }
 0x3b8   : > { %1459 = vrot.lane.b32.xlu0 %v1419_v61, %s2073_s9  ;;  %v1409_v25 = vmin.f32 %v1345_v21, %v1393_v44  ;;  %v1392_v35 = vmul.f32 %v1376_v58, %v2700_v37  ;;  %v1362_v33 = vmax.f32 %v2063_v31, 0.9  ;;  %v1422_v7 = vsub.f32 0.0, %v1406_v53 }
 0x3b9   : > { %v1346_v48 = vmul.f32 %v2063_v31, %v2721_v51  ;;  %v1161_v61 = vsub.f32 %v2185_v4, %v2510_v63  ;;  %v1178_v60 = vsel %vm1160_vm2, %v1162_v50, 0.0  ;;  %v1179_v52 = vsel %vm1160_vm2, %v1163_v15, 0.0  ;;  %v3400_v15 = vld [vmem:[#allocation14_spill] sm:$0xff] }
 0x3ba   : > { %v1425_v56 = vsub.f32 0.0, %v1409_v25  ;;  %v1408_v54 = vmin.f32 %v1344_v20, %v1392_v35  ;;  %v1378_v42 = vmin.f32 %v1362_v33, 1.1  ;;  %1465 = vrot.lane.b32.xlu1 %v1422_v7, %s2073_s9  ;;  %v1194_v44 = vmul.f32 %v1178_v60, %v1178_v60  ;;  %v3398_v60 = vld [vmem:[#allocation4_spill] sm:$0xff] }
 0x3bb   : > { %v1177_v21 = vsel %vm1160_vm2, %v1161_v61, 0.0  ;;  %v1164_v58 = vsub.f32 %v2193_v6, %v2568_v3  ;;  %v1195_v53 = vmul.f32 %v1179_v52, %v1179_v52  ;;  %v1181_v33 = vsel %vm1160_vm2, %v1165_v19, 0.0  ;;  %v3397_v61 = vld [vmem:[#allocation27_spill] sm:$0xff]  ;;  %v3401_v19 = vld [vmem:[#allocation28_spill] sm:$0xff] }
 0x3bc   : > { %1471 = vrot.lane.b32.xlu0 %v1425_v56, %s2073_s9  ;;  %v1394_v9 = vmul.f32 %v1378_v42, %v2721_v51  ;;  %v1424_v27 = vsub.f32 0.0, %v1408_v54  ;;  %v1193_v63 = vmul.f32 %v1177_v21, %v1177_v21  ;;  %v1182_v3 = vsel %vm1160_vm2, %v1166_v39, 0.0 }
 0x3bd   : > { %v1180_v25 = vsel %vm1160_vm2, %v1164_v58, 0.0  ;;  %v1197_v56 = vmul.f32 %v1181_v33, %v1181_v33  ;;  %v1198_v47 = vmul.f32 %v1182_v3, %v1182_v3  ;;  %v2812_v42 = vsel %vm904_vm3, %v2174_v1, 128 }
 0x3be   : > { %v1410_v26 = vmin.f32 %v1346_v48, %v1394_v9  ;;  %1469 = vrot.lane.b32.xlu1 %v1424_v27, %s2073_s9  ;;  %v1209_v31 = vadd.f32 %v1194_v44, %v1193_v63  ;;  %v1196_v35 = vmul.f32 %v1180_v25, %v1180_v25  ;;  %vm906_vm4 = vcmp.ge.f32.partialorder %v3393_v24, %v2305_v34  ;;  %v3394_v9 = vld [vmem:[#allocation6_spill] sm:$0xff]  ;;  %v3406_v24 = vld [vmem:[#allocation7_spill] sm:$0xff] }
 0x3bf   : > { %v1183_v48 = vsel %vm1160_vm2, %v1167_v55, 0.0  ;;  %v1168_v50 = vsub.f32 %v3394_v9, %v2616_v38  ;;  %v937_v5 = vshra.s32 %v2812_v42, 16  ;;  %v2822_v36 = vsel %vm906_vm4, %v2174_v1, 128  ;;  %v3399_v34 = vld [vmem:[#allocation10_spill] sm:$0xff] }
 0x3c0   : > { %1467 = vrot.lane.b32.xlu0 %v1423_v30, %s2073_s9  ;;  %v1426_v46 = vsub.f32 0.0, %v1410_v26  ;;  %v1210_v20 = vadd.f32 %v1209_v31, %v1195_v53  ;;  %v1199_v32 = vmul.f32 %v1183_v48, %v1183_v48  ;;  %v3395_v30 = vld [vmem:[#allocation26_spill] sm:$0xff]  ;;  %v3396_v26 = vld [vmem:[#allocation3_spill] sm:$0xff]  ;;  %vm905_vm6 = vcmp.ge.f32.partialorder %v3398_v60, %v3397_v61 }
 0x3c1   : > { %vm907_vm5 = vcmp.ge.f32.partialorder %v3396_v26, %v3395_v30  ;;  %v1184_v21 = vsel %vm1160_vm2, %v1168_v50, 0.0  ;;  %v1170_v44 = vsub.f32 %v3400_v15, %v2654_v18  ;;  %v2834_v63 = vcvt.s32.f32 %v937_v5  ;;  %v3403_v25 = vld [vmem:[#allocation30_spill] sm:$0xff]  ;;  %v3407_v48 = vld [vmem:[#allocation31_spill] sm:$0xff] }
 0x3c2   : > { %1473 = vrot.lane.b32.xlu1 %v1426_v46, %s2073_s9  ;;  %v1211_v7 = vadd.f32 %v1210_v20, %v1196_v35  ;;  %v1169_v46 = vsub.f32 %v3399_v34, %v2610_v23  ;;  %v965_v52 = vshra.s32 %v2822_v36, 16  ;;  %v2838_v58 = vsel %vm907_vm5, %v2174_v1, 128  ;;  %v3402_v23 = vld [vmem:[#allocation5_spill] sm:$0xff]  ;;  %v3404_v20 = vld [vmem:[#allocation8_spill] sm:$0xff]  ;;  %v3408_v50 = vld [vmem:[#allocation11_spill] sm:$0xff] }
 0x3c3   : > { %v2841_v31 = vsel %vm905_vm6, %v2174_v1, 128  ;;  %v1200_v53 = vmul.f32 %v1184_v21, %v1184_v21  ;;  %vm908_vm7 = vcmp.ge.f32.partialorder %v3402_v23, %v3401_v19  ;;  %vm909_vm8 = vcmp.ge.f32.partialorder %v3404_v20, %v3403_v25  ;;  %v3414_v23 = vld [vmem:[#allocation13_spill] sm:$0xff] }
 0x3c4   : > { %v1212_v54 = vadd.f32 %v1211_v7, %v1197_v56  ;;  %v1185_v18 = vsel %vm1160_vm2, %v1169_v46, 0.0  ;;  %v1186_v35 = vsel %vm1160_vm2, %v1170_v44, 0.0  ;;  %v2852_v33 = vcvt.s32.f32 %v965_v52  ;;  %v3410_v44 = vld [vmem:[#allocation32_spill] sm:$0xff]  ;;  %v3412_v52 = vld [vmem:[#allocation34_spill] sm:$0xff] }
 0x3c5   : > { %v979_v7 = vshra.s32 %v2838_v58, 16  ;;  %v951_v3 = vshra.s32 %v2841_v31, 16  ;;  %v2857_v56 = vsel %vm908_vm7, %v2174_v1, 128  ;;  %v2860_v55 = vsel %vm909_vm8, %v2174_v1, 128 }
 0x3c6   : > { %v1213_v27 = vadd.f32 %v1212_v54, %v1198_v47  ;;  %v1201_v47 = vmul.f32 %v1185_v18, %v1185_v18  ;;  %v3405_v54 = vld [vmem:[#allocation29_spill] sm:$0xff]  ;;  %vm911_vm10 = vcmp.ge.f32.partialorder %v3408_v50, %v3407_v48  ;;  %v993_v60 = vshra.s32 %v2857_v56, 16  ;;  %v3417_v48 = vld [vmem:[#allocation35_spill] sm:$0xff] }
 0x3c7   : > { %vm910_vm9 = vcmp.ge.f32.partialorder %v3406_v24, %v3405_v54  ;;  %v2869_v26 = vcvt.s32.f32 %v979_v7  ;;  %v2871_v61 = vcvt.s32.f32 %v951_v3  ;;  %v1007_v46 = vshra.s32 %v2860_v55, 16  ;;  %v3415_v54 = vld [vmem:[#allocation33_spill] sm:$0xff]  ;;  %v3416_v24 = vld [vmem:[#allocation15_spill] sm:$0xff] }
 0x3c8   : > { %v1214_v38 = vadd.f32 %v1213_v27, %v1199_v32  ;;  %v3409_v27 = vld [vmem:[#allocation9_spill] sm:$0xff]  ;;  %v1202_v32 = vmul.f32 %v1186_v35, %v1186_v35  ;;  %v2876_v21 = vsel %vm910_vm9, %v2174_v1, 128  ;;  %v1172_v25 = vsub.f32 %v3414_v23, %v2674_v40  ;;  %v3418_v50 = vld [vmem:[#allocation19_spill] sm:$0xff] }
 0x3c9   : > { %v1171_v5 = vsub.f32 %v3409_v27, %v2634_v41  ;;  %v3411_v41 = vld [vmem:[#allocation12_spill] sm:$0xff]  ;;  %v2891_v18 = vcvt.s32.f32 %v993_v60  ;;  %v1021_v35 = vshra.s32 %v2876_v21, 16  ;;  %vm914_vm13 = vcmp.ge.f32.partialorder %v3416_v24, %v3415_v54  ;;  %v3420_v60 = vld [vmem:[#allocation22_spill] sm:$0xff] }
 0x3ca   : > { %v1215_v39 = vadd.f32 %v1214_v38, %v1200_v53  ;;  %v2879_v38 = vsel %vm911_vm10, %v2174_v1, 128  ;;  %vm912_vm11 = vcmp.ge.f32.partialorder %v3411_v41, %v3410_v44  ;;  %v3413_v53 = vld [vmem:[#allocation16_spill] sm:$0xff]  ;;  %vm915_vm14 = vcmp.ge.f32.partialorder %v3418_v50, %v3417_v48 }
 0x3cb   : > { %vm913_vm12 = vcmp.ge.f32.partialorder %v3413_v53, %v3412_v52  ;;  %v1187_v19 = vsel %vm1160_vm2, %v1171_v5, 0.0  ;;  %v1035_v7 = vshra.s32 %v2879_v38, 16  ;;  %v2898_v3 = vsel %vm912_vm11, %v2174_v1, 128  ;;  %v3419_v5 = vld [vmem:[#allocation18_spill] sm:$0xff]  ;;  %v3421_v24 = vld [vmem:[#allocation36_spill] sm:$0xff] }
 0x3cc   : > { %v1216_v30 = vadd.f32 %v1215_v39, %v1201_v47  ;;  %v2893_v39 = vcvt.s32.f32 %v1007_v46  ;;  %v2901_v47 = vsel %vm913_vm12, %v2174_v1, 128  ;;  %v1203_v40 = vmul.f32 %v1187_v19, %v1187_v19  ;;  %v3422_v48 = vld [vmem:[#allocation20_spill] sm:$0xff] }
 0x3cd   : > { %v1174_v46 = vsub.f32 %v3420_v60, %v2700_v37  ;;  %v2915_v41 = vcvt.s32.f32 %v1021_v35  ;;  %v2917_v52 = vcvt.s32.f32 %v1035_v7  ;;  %v1049_v53 = vshra.s32 %v2898_v3, 16  ;;  %v3423_v37 = vld [vmem:[#allocation38_spill] sm:$0xff]  ;;  %v3426_v60 = vld [vmem:[#allocation23_spill] sm:$0xff] }
 0x3ce   : > { %v1217_v20 = vadd.f32 %v1216_v30, %v1202_v32  ;;  %v1173_v32 = vsub.f32 %v3419_v5, %v2670_v17  ;;  %v1188_v30 = vsel %vm1160_vm2, %v1172_v25, 0.0  ;;  %v1063_v19 = vshra.s32 %v2901_v47, 16 }
 0x3cf   : > { %v2922_v17 = vsel %vm914_vm13, %v2174_v1, 128  ;;  %v2925_v25 = vsel %vm915_vm14, %v2174_v1, 128  ;;  %v1204_v54 = vmul.f32 %v1188_v30, %v1188_v30  ;;  %vm916_vm15 = vcmp.ge.f32.partialorder %v3422_v48, %v3421_v24 }
 0x3d0   : > { %v1218_v44 = vadd.f32 %v1217_v20, %v1203_v40  ;;  %v3424_v20 = vld [vmem:[#allocation24_spill] sm:$0xff]  ;;  %v1189_v35 = vsel %vm1160_vm2, %v1173_v32, 0.0  ;;  %v1190_v7 = vsel %vm1160_vm2, %v1174_v46, 0.0  ;;  %v2937_v50 = vcvt.s32.f32 %v1049_v53  ;;  %v3425_v32 = vld [vmem:[#allocation37_spill] sm:$0xff]  ;;  %v3427_v46 = vld [vmem:[#allocation39_spill] sm:$0xff] }
 0x3d1   : > { %vm917_vm1 = vcmp.ge.f32.partialorder %v3424_v20, %v3423_v37  ;;  %v2939_v30 = vcvt.s32.f32 %v1063_v19  ;;  %v1077_v24 = vshra.s32 %v2922_v17, 16  ;;  %v1091_v48 = vshra.s32 %v2925_v25, 16  ;;  %v3429_v19 = vld [vmem:[#allocation17_spill] sm:$0xff] }
 0x3d2   : > { %v1219_v40 = vadd.f32 %v1218_v44, %v1204_v54  ;;  %v2944_v37 = vsel %vm916_vm15, %v2174_v1, 128  ;;  %v2947_v20 = vsel %vm917_vm1, %v2174_v1, 128  ;;  %v1205_v16 = vmul.f32 %v1189_v35, %v1189_v35  ;;  %v3428_v44 = vld [vmem:[#allocation25_spill] sm:$0xff] }
 0x3d3   : > { %vm918_vm3 = vcmp.ge.f32.partialorder %v3426_v60, %v3425_v32  ;;  %vm919_vm4 = vcmp.ge.f32.partialorder %v3428_v44, %v3427_v46  ;;  %v1206_v53 = vmul.f32 %v1190_v7, %v1190_v7  ;;  %v1175_v54 = vsub.f32 %v3429_v19, %v2686_v43  ;;  %v3430_v43 = vld [vmem:[#allocation21_spill] sm:$0xff] }
 0x3d4   : > { %v1220_v59 = vadd.f32 %v1219_v40, %v1205_v16  ;;  %v2957_v29 = vcvt.s32.f32 %v1077_v24  ;;  %v2959_v23 = vcvt.s32.f32 %v1091_v48  ;;  %v1105_v35 = vshra.s32 %v2944_v37, 16 }
 0x3d5   : > { %v1119_v60 = vshra.s32 %v2947_v20, 16  ;;  %v2964_v32 = vsel %vm918_vm3, %v2174_v1, 128  ;;  %v2967_v46 = vsel %vm919_vm4, %v2174_v1, 128  ;;  %v1176_v16 = vsub.f32 %v3430_v43, %v2721_v51 }
 0x3d6   : > { %v1191_v7 = vsel %vm1160_vm2, %v1175_v54, 0.0  ;;  %v1221_v40 = vadd.f32 %v1220_v59, %v1206_v53  ;;  %v2975_v24 = vcvt.s32.f32 %v1105_v35  ;;  %v1133_v44 = vshra.s32 %v2964_v32, 16 }
 0x3d7   : > { %v2977_v48 = vcvt.s32.f32 %v1119_v60  ;;  %v1147_v19 = vshra.s32 %v2967_v46, 16  ;;  %v1207_v22 = vmul.f32 %v1191_v7, %v1191_v7  ;;  %v1192_v51 = vsel %vm1160_vm2, %v1176_v16, 0.0 }
 0x3d8   : > { %v2985_v43 = vcvt.s32.f32 %v1133_v44  ;;  %v1208_v53 = vmul.f32 %v1192_v51, %v1192_v51  ;;  %vm1491_vm5 = vcmask 7168  }
 0x3d9   : > { %v2987_v54 = vcvt.s32.f32 %v1147_v19  ;;  %v1222_v59 = vadd.f32 %v1221_v40, %v1207_v22 }
 0x3db   : > { %v1223_v35 = vadd.f32 %v1222_v59, %v1208_v53 }
 0x3df   : > { %940 = vmin.xlane.f32.xlu0 %v2834_v63 }
 0x3e3   : > { %968 = vmin.xlane.f32.xlu0 %v2852_v33 }
 0x3e6   : > { %954 = vmin.xlane.f32.xlu1 %v2871_v61 }
 0x3e7   : > { %982 = vmin.xlane.f32.xlu0 %v2869_v26 }
 0x3ea   : > { %1010 = vmin.xlane.f32.xlu1 %v2893_v39 }
 0x3eb   : > { %996 = vmin.xlane.f32.xlu0 %v2891_v18 }
 0x3ee   : > { %1038 = vmin.xlane.f32.xlu1 %v2917_v52 }
 0x3ef   : > { %1024 = vmin.xlane.f32.xlu0 %v2915_v41 }
 0x3f2   : > { %1066 = vmin.xlane.f32.xlu1 %v2939_v30 }
 0x3f3   : > { %1052 = vmin.xlane.f32.xlu0 %v2937_v50 }
 0x3f6   : > { %1094 = vmin.xlane.f32.xlu1 %v2959_v23 }
 0x3f7   : > { %1080 = vmin.xlane.f32.xlu0 %v2957_v29 }
 0x3fa   : > { %1122 = vmin.xlane.f32.xlu1 %v2977_v48 }
 0x3fb   : > { %1108 = vmin.xlane.f32.xlu0 %v2975_v24 }
 0x3fe   : > { %1150 = vmin.xlane.f32.xlu1 %v2987_v54 }
 0x3ff   : > { %1136 = vmin.xlane.f32.xlu0 %v2985_v43 }
 0x403   : > { %1224 = vadd.xlane.f32.xlu0 %v1223_v35 }
 0x407   : > { %1563 = vadd.xlane.f32.xlu0 %v2732_v12 }
 0x40e   : > { %v1444_v7 = vpop.permute.xlu0 %1443 }
 0x40f   : > { %v1492_v16 = vsel %vm1491_vm5, %v1444_v7, 0.0 }
 0x412   : > { %v1448_v60 = vpop.permute.xlu1 %1447 }
 0x413   : > { %v1495_v22 = vsel %vm1491_vm5, %v1448_v60, 0.0 }
 0x416   : > { %v1446_v5 = vpop.permute.xlu1 %1445 }
 0x417   : > { %v1493_v44 = vsel %vm1491_vm5, %v1446_v5, 0.0 }
 0x418   : > { %v1494_v19 = vadd.f32 %v1493_v44, %v1492_v16 }
 0x41a   : > { %v1450_v49 = vpop.permute.xlu1 %1449  ;;  %v1496_v15 = vadd.f32 %v1495_v22, %v1494_v19 }
 0x41b   : > { %v1497_v51 = vsel %vm1491_vm5, %v1450_v49, 0.0 }
 0x41c   : > { %v1456_v40 = vpop.permute.xlu0 %1455  ;;  %v1498_v53 = vadd.f32 %v1497_v51, %v1496_v15 }
 0x41d   : > { %v1503_v5 = vsel %vm1491_vm5, %v1456_v40, 0.0 }
 0x41e   : > { %v1454_v59 = vpop.permute.xlu1 %1453 }
 0x41f   : > { %v1501_v0 = vsel %vm1491_vm5, %v1454_v59, 0.0 }
 0x420   : > { %v1452_v35 = vpop.permute.xlu0 %1451 }
 0x421   : > { %v1499_v12 = vsel %vm1491_vm5, %v1452_v35, 0.0 }
 0x422   : > { %v1500_v28 = vadd.f32 %v1499_v12, %v1498_v53 }
 0x423   : > { %v1458_v27 = vpop.permute.xlu1 %1457 }
 0x424   : > { %v1502_v7 = vadd.f32 %v1501_v0, %v1500_v28  ;;  %v1505_v60 = vsel %vm1491_vm5, %v1458_v27, 0.0 }
 0x426   : > { %v1464_v16 = vpop.permute.xlu0 %1463  ;;  %v1504_v44 = vadd.f32 %v1503_v5, %v1502_v7 }
 0x427   : > { %v1511_v59 = vsel %vm1491_vm5, %v1464_v16, 0.0  ;;  %v936_v16 = vand.u32 65535, %v2812_v42 }
 0x428   : > { %v1462_v9 = vpop.permute.xlu1 %1461  ;;  %v1506_v19 = vadd.f32 %v1505_v60, %v1504_v44 }
 0x429   : > { %v1509_v51 = vsel %vm1491_vm5, %v1462_v9, 0.0 }
 0x42a   : > { %v1460_v22 = vpop.permute.xlu0 %1459 }
 0x42b   : > { %v1507_v49 = vsel %vm1491_vm5, %v1460_v22, 0.0 }
 0x42c   : > { %v1508_v15 = vadd.f32 %v1507_v49, %v1506_v19  ;;  %v1466_v35 = vpop.permute.xlu1 %1465 }
 0x42d   : > { %v1513_v28 = vsel %vm1491_vm5, %v1466_v35, 0.0 }
 0x42e   : > { %v1510_v53 = vadd.f32 %v1509_v51, %v1508_v15  ;;  %v1472_v12 = vpop.permute.xlu0 %1471 }
 0x42f   : > { %v1519_v9 = vsel %vm1491_vm5, %v1472_v12, 0.0 }
 0x430   : > { %v1512_v0 = vadd.f32 %v1511_v59, %v1510_v53  ;;  %v1470_v40 = vpop.permute.xlu1 %1469  ;;  %v938_v53 = vcvt.s32.f32 %v936_v16  ;;  %v964_v59 = vand.u32 65535, %v2822_v36 }
 0x431   : > { %v1517_v60 = vsel %vm1491_vm5, %v1470_v40, 0.0  ;;  %v950_v40 = vand.u32 65535, %v2841_v31 }
 0x432   : > { %v1514_v7 = vadd.f32 %v1513_v28, %v1512_v0  ;;  %v1468_v5 = vpop.permute.xlu0 %1467  ;;  %v966_v12 = vcvt.s32.f32 %v964_v59 }
 0x433   : > { %v1515_v27 = vsel %vm1491_vm5, %v1468_v5, 0.0  ;;  %v952_v36 = vcvt.s32.f32 %v950_v40 }
 0x434   : > { %v1516_v44 = vadd.f32 %v1515_v27, %v1514_v7  ;;  %v1474_v19 = vpop.permute.xlu1 %1473  ;;  %v992_v27 = vand.u32 65535, %v2857_v56  ;;  %v1006_v56 = vand.u32 65535, %v2860_v55  ;;  %v1034_v55 = vand.u32 65535, %v2879_v38 }
 0x435   : > { %v1521_v15 = vsel %vm1491_vm5, %v1474_v19, 0.0  ;;  %v1020_v19 = vand.u32 65535, %v2876_v21  ;;  %v1048_v21 = vand.u32 65535, %v2898_v3  ;;  %v1076_v3 = vand.u32 65535, %v2922_v17 }
 0x436   : > { %v1518_v22 = vadd.f32 %v1517_v60, %v1516_v44  ;;  %v994_v60 = vcvt.s32.f32 %v992_v27  ;;  %v1036_v59 = vcvt.s32.f32 %v1034_v55  ;;  %v1062_v38 = vand.u32 65535, %v2901_v47 }
 0x437   : > { %v1078_v40 = vcvt.s32.f32 %v1076_v3  ;;  %v1104_v17 = vand.u32 65535, %v2944_v37  ;;  %v1090_v47 = vand.u32 65535, %v2925_v25  ;;  %v1132_v37 = vand.u32 65535, %v2964_v32 }
 0x438   : > { %v1520_v49 = vadd.f32 %v1519_v9, %v1518_v22  ;;  %v1118_v25 = vand.u32 65535, %v2947_v20 }
 0x43a   : > { %v1522_v51 = vadd.f32 %v1521_v15, %v1520_v49  ;;  %v1022_v49 = vcvt.s32.f32 %v1020_v19  ;;  %v1008_v15 = vcvt.s32.f32 %v1006_v56  ;;  %v1134_v56 = vcvt.s32.f32 %v1132_v37 }
 0x43b   : > { %v1120_v32 = vcvt.s32.f32 %v1118_v25 }
 0x43c   : > { %1523 = vadd.xlane.f32.xlu1 %v1522_v51 }
 0x468   : > { %v3009_v35 = vpop.xlane.xlu0 %940 }
 0x469   : > { %vm942_vm6 = vcmp.eq.f32.partialorder %v2834_v63, %v3009_v35  ;;  %v978_v63 = vand.u32 65535, %v2838_v58 }
 0x46a   : > { %v943_v0 = vsel %vm942_vm6, %v938_v53, inf  ;;  %v1050_v53 = vcvt.s32.f32 %v1048_v21 }
 0x46b   : > { %944 = vmin.xlane.f32.xlu1 %v943_v0  ;;  %v980_v22 = vcvt.s32.f32 %v978_v63  ;;  %v1106_v63 = vcvt.s32.f32 %v1104_v17 }
 0x46c   : > { %v3014_v28 = vpop.xlane.xlu0 %968 }
 0x46d   : > { %vm970_vm7 = vcmp.eq.f32.partialorder %v2852_v33, %v3014_v28  ;;  %v975_v37 = vcvt.f32.s32 %v3014_v28 }
 0x46e   : > { %v971_v7 = vsel %vm970_vm7, %v966_v12, inf }
 0x46f   : > { %972 = vmin.xlane.f32.xlu1 %v971_v7  ;;  %v3021_v5 = vpop.xlane.xlu1 %954  ;;  %v1064_v7 = vcvt.s32.f32 %v1062_v38 }
 0x470   : > { %v3019_v42 = vpop.xlane.xlu0 %982  ;;  %vm956_vm8 = vcmp.eq.f32.partialorder %v2871_v61, %v3021_v5 }
 0x471   : > { %v957_v44 = vsel %vm956_vm8, %v952_v36, inf  ;;  %vm984_vm9 = vcmp.eq.f32.partialorder %v2869_v26, %v3019_v42  ;;  %vm1588_vm8 = vcmp.eq.s32.totalorder %v2174_v1, 9 }
 0x472   : > { %958 = vmin.xlane.f32.xlu0 %v957_v44  ;;  %v985_v61 = vsel %vm984_vm9, %v980_v22, inf  ;;  %v1092_v44 = vcvt.s32.f32 %v1090_v47  ;;  %vm1655_vm9 = vcmp.eq.s32.totalorder %v2174_v1, 2 }
 0x473   : > { %v3031_v33 = vpop.xlane.xlu1 %1010 }
 0x474   : > { %v3029_v31 = vpop.xlane.xlu0 %996  ;;  %vm1012_vm11 = vcmp.eq.f32.partialorder %v2893_v39, %v3031_v33 }
 0x475   : > { %vm998_vm10 = vcmp.eq.f32.partialorder %v2891_v18, %v3029_v31  ;;  %v1013_v51 = vsel %vm1012_vm11, %v1008_v15, inf  ;;  %vm1654_vm11 = vcmp.eq.s32.totalorder %v2174_v1, 1 }
 0x476   : > { %v999_v58 = vsel %vm998_vm10, %v994_v60, inf  ;;  %986 = vmin.xlane.f32.xlu0 %v985_v61  ;;  %vm1653_vm10 = vcmp.eq.s32.totalorder %v2174_v1, 0 }
 0x477   : > { %1000 = vmin.xlane.f32.xlu1 %v999_v58  ;;  %v3041_v9 = vpop.xlane.xlu1 %1038 }
 0x478   : > { %v3039_v26 = vpop.xlane.xlu0 %1024  ;;  %vm1040_vm13 = vcmp.eq.f32.partialorder %v2917_v52, %v3041_v9 }
 0x479   : > { %vm1026_vm12 = vcmp.eq.f32.partialorder %v2915_v41, %v3039_v26  ;;  %v1041_v0 = vsel %vm1040_vm13, %v1036_v59, inf }
 0x47a   : > { %v1027_v18 = vsel %vm1026_vm12, %v1022_v49, inf  ;;  %1014 = vmin.xlane.f32.xlu0 %v1013_v51 }
 0x47b   : > { %1028 = vmin.xlane.f32.xlu1 %v1027_v18  ;;  %v3051_v16 = vpop.xlane.xlu1 %1066 }
 0x47c   : > { %v3049_v39 = vpop.xlane.xlu0 %1052  ;;  %vm1068_vm15 = vcmp.eq.f32.partialorder %v2939_v30, %v3051_v16 }
 0x47d   : > { %vm1054_vm14 = vcmp.eq.f32.partialorder %v2937_v50, %v3049_v39  ;;  %v1069_v36 = vsel %vm1068_vm15, %v1064_v7, inf }
 0x47e   : > { %v1055_v41 = vsel %vm1054_vm14, %v1050_v53, inf  ;;  %1042 = vmin.xlane.f32.xlu0 %v1041_v0 }
 0x47f   : > { %1056 = vmin.xlane.f32.xlu1 %v1055_v41  ;;  %v3061_v12 = vpop.xlane.xlu1 %1094 }
 0x480   : > { %v3059_v52 = vpop.xlane.xlu0 %1080  ;;  %vm1096_vm3 = vcmp.eq.f32.partialorder %v2959_v23, %v3061_v12  ;;  %v1146_v23 = vand.u32 65535, %v2967_v46 }
 0x481   : > { %vm1082_vm1 = vcmp.eq.f32.partialorder %v2957_v29, %v3059_v52  ;;  %v1097_v60 = vsel %vm1096_vm3, %v1092_v44, inf }
 0x482   : > { %v1083_v50 = vsel %vm1082_vm1, %v1078_v40, inf  ;;  %1070 = vmin.xlane.f32.xlu0 %v1069_v36  ;;  %v947_v36 = vcvt.f32.s32 %v3009_v35  ;;  %v989_v35 = vcvt.f32.s32 %v3019_v42 }
 0x483   : > { %1084 = vmin.xlane.f32.xlu1 %v1083_v50  ;;  %v3071_v27 = vpop.xlane.xlu1 %1122 }
 0x484   : > { %v3069_v30 = vpop.xlane.xlu0 %1108  ;;  %vm1124_vm5 = vcmp.eq.f32.partialorder %v2977_v48, %v3071_v27  ;;  %v1148_v48 = vcvt.s32.f32 %v1146_v23  ;;  %v948_v44 = vshll.u32 %v947_v36, 16  ;;  %v976_v23 = vshll.u32 %v975_v37, 16 }
 0x485   : > { %vm1110_vm4 = vcmp.eq.f32.partialorder %v2975_v24, %v3069_v30  ;;  %v1125_v24 = vsel %vm1124_vm5, %v1120_v32, inf }
 0x486   : > { %v1111_v29 = vsel %vm1110_vm4, %v1106_v63, inf  ;;  %1098 = vmin.xlane.f32.xlu0 %v1097_v60 }
 0x487   : > { %1112 = vmin.xlane.f32.xlu1 %v1111_v29  ;;  %v3082_v19 = vpop.xlane.xlu1 %1150 }
 0x488   : > { %v3080_v22 = vpop.xlane.xlu0 %1136  ;;  %vm1152_vm7 = vcmp.eq.f32.partialorder %v2987_v54, %v3082_v19 }
 0x489   : > { %vm1138_vm6 = vcmp.eq.f32.partialorder %v2985_v43, %v3080_v22  ;;  %v1153_v46 = vsel %vm1152_vm7, %v1148_v48, inf }
 0x48a   : > { %v1139_v20 = vsel %vm1138_vm6, %v1134_v56, inf  ;;  %1126 = vmin.xlane.f32.xlu0 %v1125_v24  ;;  %v961_v56 = vcvt.f32.s32 %v3021_v5  ;;  %v1003_v5 = vcvt.f32.s32 %v3029_v31  ;;  %v990_v31 = vshll.u32 %v989_v35, 16 }
 0x48b   : > { %1140 = vmin.xlane.f32.xlu1 %v1139_v20 }
 0x48c   : > { %v1225_v58 = vpop.xlane.xlu0 %1224 }
 0x48d   : > { %v1226_v61 = vrot.slane %v1225_v58, 4 }
 0x48e   : > { %1154 = vmin.xlane.f32.xlu0 %v1153_v46  ;;  %v962_v46 = vshll.u32 %v961_v56, 16 }
 0x48f   : > { %v1227_v49 = vadd.f32 %v1226_v61, %v1225_v58  ;;  %v1017_v58 = vcvt.f32.s32 %v3031_v33 }
 0x490   : > { %v1564_v51 = vpop.xlane.xlu0 %1563 }
 0x491   : > { %v1228_v15 = vrot.slane %v1227_v49, 2  ;;  %v1565_v43 = vrot.slane %v1564_v51, 4 }
 0x493   : > { %v1229_v21 = vadd.f32 %v1228_v15, %v1227_v49  ;;  %v1566_v53 = vadd.f32 %v1565_v43, %v1564_v51  ;;  %v3431_v49 = vld [vmem:[#allocation40_spill] sm:$0xff]  ;;  %v1018_v43 = vshll.u32 %v1017_v58, 16 }
 0x495   : > { %v1230_v55 = vrot.slane %v1229_v21, 1  ;;  %v1567_v59 = vrot.slane %v1566_v53, 2 }
 0x497   : > { %v1231_v18 = vadd.f32 %v1230_v55, %v1229_v21  ;;  %v1568_v41 = vadd.f32 %v1567_v59, %v1566_v53  ;;  %v1031_v55 = vcvt.f32.s32 %v3039_v26  ;;  %v1045_v53 = vcvt.f32.s32 %v3041_v9 }
 0x498   : > { %v1087_v9 = vcvt.f32.s32 %v3059_v52 }
 0x499   : > { %1896 = vpush %v1231_v18  ;;  %v1569_v7 = vrot.slane %v1568_v41, 1  ;;  %v1059_v18 = vcvt.f32.s32 %v3049_v39 }
 0x49b   : > { %v1570_v50 = vadd.f32 %v1569_v7, %v1568_v41  ;;  %v1060_v7 = vshll.u32 %v1059_v18, 16 }
 0x4c5   : > { %v1524_v3 = vpop.xlane.xlu1 %1523 }
 0x4c6   : > { %v1525_v38 = vrot.slane %v1524_v3, 4 }
 0x4c8   : > { %v1526_v54 = vadd.f32 %v1525_v38, %v1524_v3  ;;  %v3432_v3 = vld [vmem:[#allocation41_spill] sm:$0xff] }
 0x4ca   : > { %v1527_v0 = vrot.slane %v1526_v54, 2  ;;  %s3130_s19 = spop %1896 }
 0x4cc   : > { %v1528_v40 = vadd.f32 %v1527_v0, %v1526_v54 }
 0x4ce   : > { %v1529_v17 = vrot.slane %v1528_v40, 1 }
 0x4d0   : > { %v1530_v47 = vadd.f32 %v1529_v17, %v1528_v40  ;;  %v1032_v40 = vshll.u32 %v1031_v55, 16  ;;  %v1073_v17 = vcvt.f32.s32 %v3051_v16  ;;  %v1046_v55 = vshll.u32 %v1045_v53, 16 }
 0x4d2   : > { %1898 = vpush %v1530_v47 }
 0x4d3   : > { %1900 = vpush %v1570_v50 }
 0x4f4   : > { %v945_v63 = vpop.xlane.xlu1 %944 }
 0x4f5   : > { %v946_v25 = vcvt.f32.s32 %v945_v63 }
 0x4f7   : > { %v949_v29 = vadd.s32 %v948_v44, %v946_v25  ;;  %v3433_v44 = vld [vmem:[#allocation42_spill] sm:$0xff] }
 0x4f8   : > { %v973_v60 = vpop.xlane.xlu1 %972 }
 0x4f9   : > { %v1572_v32 = vcvt.s32.f32 %v949_v29  ;;  %v974_v20 = vcvt.f32.s32 %v973_v60 }
 0x4fb   : > { %v1589_v28 = vsel %vm1588_vm8, %v1572_v32, 0.0  ;;  %v977_v24 = vadd.s32 %v976_v23, %v974_v20  ;;  %v959_v61 = vpop.xlane.xlu0 %958  ;;  %v1101_v23 = vcvt.f32.s32 %v3061_v12  ;;  %v1660_v20 = vstv %s3130_s19 }
 0x4fc   : > { %v1605_v48 = vsel %vm1160_vm2, %v2185_v4, %v1589_v28  ;;  %v960_v21 = vcvt.f32.s32 %v959_v61  ;;  %v1004_v4 = vshll.u32 %v1003_v5, 16 }
 0x4fd   : > { %v1621_v42 = vsel %vm663_vm0, %v3431_v49, %v1605_v48  ;;  %v1574_v15 = vcvt.s32.f32 %v977_v24 }
 0x4fe   : > { %1637 = vst [vmem:[%s3097_s12] sm:$0xff] %v1621_v42  ;;  %v963_v51 = vadd.s32 %v962_v46, %v960_v21  ;;  %v3434_v42 = vld [vmem:[#allocation43_spill] sm:$0xff] }
 0x4ff   : > { %v1591_v33 = vsel %vm1588_vm8, %v1574_v15, 0.0  ;;  %v987_v39 = vpop.xlane.xlu0 %986 }
 0x500   : > { %v1607_v26 = vsel %vm1160_vm2, %v2177_v2, %v1591_v33  ;;  %v1001_v59 = vpop.xlane.xlu1 %1000  ;;  %v1573_v54 = vcvt.s32.f32 %v963_v51  ;;  %v988_v0 = vcvt.f32.s32 %v987_v39  ;;  %v1115_v33 = vcvt.f32.s32 %v3069_v30 }
 0x501   : > { %v1623_v38 = vsel %vm663_vm0, %v3432_v3, %v1607_v26  ;;  %v1002_v41 = vcvt.f32.s32 %v1001_v59  ;;  %v1088_v26 = vshll.u32 %v1087_v9, 16 }
 0x502   : > { %1639 = vst [vmem:[%s3097_s12 + $0x10] sm:$0xff] %v1623_v38  ;;  %v1590_v2 = vsel %vm1588_vm8, %v1573_v54, 0.0  ;;  %v991_v50 = vadd.s32 %v990_v31, %v988_v0  ;;  %v1074_v31 = vshll.u32 %v1073_v17, 16  ;;  %v1116_v17 = vshll.u32 %v1115_v33, 16 }
 0x503   : > { %v1005_v47 = vadd.s32 %v1004_v4, %v1002_v41  ;;  %s1899_s13 = spop %1898  ;;  %v1606_v36 = vsel %vm1160_vm2, %v2201_v8, %v1590_v2  ;;  %v1015_v63 = vpop.xlane.xlu0 %1014 }
 0x504   : > { %v1658_v16 = vstv %s1899_s13  ;;  %s1901_s17 = spop %1900  ;;  %v1029_v52 = vpop.xlane.xlu1 %1028  ;;  %v1622_v37 = vsel %vm663_vm0, %v3433_v44, %v1606_v36  ;;  %v1575_v29 = vcvt.s32.f32 %v991_v50  ;;  %v1016_v32 = vcvt.f32.s32 %v1015_v63 }
 0x505   : > { %v1576_v25 = vcvt.s32.f32 %v1005_v47  ;;  %v1656_v60 = vstv %s1901_s17  ;;  %1638 = vst [vmem:[%s3097_s12 + $0x8] sm:$0xff] %v1622_v37  ;;  %v1030_v56 = vcvt.f32.s32 %v1029_v52  ;;  %v1143_v47 = vcvt.f32.s32 %v3080_v22  ;;  %v3435_v52 = vld [vmem:[#allocation6_spill] sm:$0xff] }
 0x506   : > { %v1657_v8 = vsel %vm1655_vm9, %v1656_v60, 0.0  ;;  %v1592_v28 = vsel %vm1588_vm8, %v1575_v29, 0.0  ;;  %v1129_v37 = vcvt.f32.s32 %v3071_v27 }
 0x507   : > { %v1593_v35 = vsel %vm1588_vm8, %v1576_v25, 0.0  ;;  %v1659_v12 = vsel %vm1654_vm11, %v1658_v16, %v1657_v8  ;;  %v1608_v5 = vsel %vm1160_vm2, %v2193_v6, %v1592_v28  ;;  %v1033_v48 = vadd.s32 %v1032_v40, %v1030_v56  ;;  %v1043_v46 = vpop.xlane.xlu0 %1042 }
 0x508   : > { %v1609_v24 = vsel %vm1160_vm2, %v2211_v11, %v1593_v35  ;;  %v1661_v58 = vsel %vm1653_vm10, %v1660_v20, %v1659_v12  ;;  %v1057_v61 = vpop.xlane.xlu1 %1056  ;;  %v1624_v15 = vsel %vm663_vm0, %v3434_v42, %v1608_v5  ;;  %v1019_v11 = vadd.s32 %v1018_v43, %v1016_v32  ;;  %v3437_v32 = vld [vmem:[#allocation9_spill] sm:$0xff]  ;;  %v3439_v5 = vld [vmem:[#allocation14_spill] sm:$0xff] }
 0x509   : > { %v1625_v49 = vsel %vm663_vm0, %v2565_v13, %v1609_v24  ;;  %1662 = vst [vmem:[%s233_s20] sm:$0xff] %v1661_v58  ;;  %v1058_v21 = vcvt.f32.s32 %v1057_v61  ;;  %1640 = vst [vmem:[%s3097_s12 + $0x18] sm:$0xff] %v1624_v15  ;;  %v1578_v6 = vcvt.s32.f32 %v1033_v48  ;;  %v1044_v18 = vcvt.f32.s32 %v1043_v46  ;;  %v3438_v24 = vld [vmem:[#allocation45_spill] sm:$0xff] }
 0x50a   : > { %1641 = vst [vmem:[%s3097_s12 + $0x20] sm:$0xff] %v1625_v49  ;;  %v1577_v51 = vcvt.s32.f32 %v1019_v11  ;;  %v1102_v13 = vshll.u32 %v1101_v23, 16  ;;  %v1157_v23 = vcvt.f32.s32 %v3082_v19  ;;  %v1144_v56 = vshll.u32 %v1143_v47, 16  ;;  %v3440_v49 = vld [vmem:[#allocation46_spill] sm:$0xff] }
 0x50b   : > { %v1061_v4 = vadd.s32 %v1060_v7, %v1058_v21  ;;  %v1595_v59 = vsel %vm1588_vm8, %v1578_v6, 0.0  ;;  %v1047_v39 = vadd.s32 %v1046_v55, %v1044_v18  ;;  %v1071_v43 = vpop.xlane.xlu0 %1070  ;;  %v1130_v46 = vshll.u32 %v1129_v37, 16  ;;  %v3441_v18 = vld [vmem:[#allocation18_spill] sm:$0xff] }
 0x50c   : > { %v1085_v3 = vpop.xlane.xlu1 %1084  ;;  %v1611_v53 = vsel %vm1160_vm2, %v2209_v10, %v1595_v59  ;;  %v1594_v38 = vsel %vm1588_vm8, %v1577_v51, 0.0  ;;  %v1072_v7 = vcvt.f32.s32 %v1071_v43  ;;  %v1158_v6 = vshll.u32 %v1157_v23, 16  ;;  %v3443_v59 = vld [vmem:[#allocation13_spill] sm:$0xff] }
 0x50d   : > { %v1580_v30 = vcvt.s32.f32 %v1061_v4  ;;  %v1086_v54 = vcvt.f32.s32 %v1085_v3  ;;  %v1627_v41 = vsel %vm663_vm0, %v2584_v62, %v1611_v53  ;;  %v1610_v0 = vsel %vm1160_vm2, %v2221_v14, %v1594_v38  ;;  %v3444_v53 = vld [vmem:[#allocation47_spill] sm:$0xff] }
 0x50e   : > { %v1579_v40 = vcvt.s32.f32 %v1047_v39  ;;  %1643 = vst [vmem:[%s3097_s12 + $0x30] sm:$0xff] %v1627_v41  ;;  %v1626_v10 = vsel %vm663_vm0, %v2596_v57, %v1610_v0  ;;  %v1075_v50 = vadd.s32 %v1074_v31, %v1072_v7  ;;  %v3445_v0 = vld [vmem:[#allocation17_spill] sm:$0xff] }
 0x50f   : > { %v1597_v9 = vsel %vm1588_vm8, %v1580_v30, 0.0  ;;  %v1089_v2 = vadd.s32 %v1088_v26, %v1086_v54  ;;  %1642 = vst [vmem:[%s3097_s12 + $0x28] sm:$0xff] %v1626_v10  ;;  %v1099_v16 = vpop.xlane.xlu0 %1098  ;;  %v3442_v26 = vld [vmem:[#allocation48_spill] sm:$0xff] }
 0x510   : > { %v1613_v14 = vsel %vm1160_vm2, %v3399_v34, %v1597_v9  ;;  %v1596_v62 = vsel %vm1588_vm8, %v1579_v40, 0.0  ;;  %v1113_v36 = vpop.xlane.xlu1 %1112  ;;  %v3436_v34 = vld [vmem:[#allocation44_spill] sm:$0xff]  ;;  %v1581_v29 = vcvt.s32.f32 %v1075_v50  ;;  %v1100_v60 = vcvt.f32.s32 %v1099_v16  ;;  %v3447_v9 = vld [vmem:[#allocation22_spill] sm:$0xff] }
 0x511   : > { %v1629_v57 = vsel %vm663_vm0, %v2629_v45, %v1613_v14  ;;  %v1612_v22 = vsel %vm1160_vm2, %v3435_v52, %v1596_v62  ;;  %v1582_v63 = vcvt.s32.f32 %v1089_v2  ;;  %v1114_v44 = vcvt.f32.s32 %v1113_v36  ;;  %v3448_v14 = vld [vmem:[#allocation49_spill] sm:$0xff] }
 0x512   : > { %1645 = vst [vmem:[%s3097_s12 + $0x40] sm:$0xff] %v1629_v57  ;;  %v1628_v25 = vsel %vm663_vm0, %v3436_v34, %v1612_v22  ;;  %v1598_v20 = vsel %vm1588_vm8, %v1581_v29, 0.0  ;;  %v1103_v35 = vadd.s32 %v1102_v13, %v1100_v60  ;;  %v3449_v36 = vld [vmem:[#allocation21_spill] sm:$0xff]  ;;  %v3450_v57 = vld [vmem:[#allocation51_spill] sm:$0xff] }
 0x513   : > { %1644 = vst [vmem:[%s3097_s12 + $0x38] sm:$0xff] %v1628_v25  ;;  %v1599_v45 = vsel %vm1588_vm8, %v1582_v63, 0.0  ;;  %v1117_v8 = vadd.s32 %v1116_v17, %v1114_v44  ;;  %v1127_v12 = vpop.xlane.xlu0 %1126  ;;  %v1614_v58 = vsel %vm1160_vm2, %v3439_v5, %v1598_v20  ;;  %v3446_v17 = vld [vmem:[#allocation50_spill] sm:$0xff] }
 0x514   : > { %v1615_v27 = vsel %vm1160_vm2, %v3437_v32, %v1599_v45  ;;  %v1141_v28 = vpop.xlane.xlu1 %1140  ;;  %v1630_v42 = vsel %vm663_vm0, %v3440_v49, %v1614_v58  ;;  %v1583_v15 = vcvt.s32.f32 %v1103_v35  ;;  %v1128_v11 = vcvt.f32.s32 %v1127_v12 }
 0x515   : > { %v1631_v19 = vsel %vm663_vm0, %v3438_v24, %v1615_v27  ;;  %v1584_v48 = vcvt.s32.f32 %v1117_v8  ;;  %v1142_v61 = vcvt.f32.s32 %v1141_v28  ;;  %1646 = vst [vmem:[%s3097_s12 + $0x48] sm:$0xff] %v1630_v42 }
 0x516   : > { %1647 = vst [vmem:[%s3097_s12 + $0x50] sm:$0xff] %v1631_v19  ;;  %v1600_v33 = vsel %vm1588_vm8, %v1583_v15, 0.0  ;;  %v1131_v51 = vadd.s32 %v1130_v46, %v1128_v11 }
 0x517   : > { %v1601_v21 = vsel %vm1588_vm8, %v1584_v48, 0.0  ;;  %v1145_v55 = vadd.s32 %v1144_v56, %v1142_v61  ;;  %v1155_v4 = vpop.xlane.xlu0 %1154  ;;  %v1616_v39 = vsel %vm1160_vm2, %v3443_v59, %v1600_v33 }
 0x518   : > { %v1617_v31 = vsel %vm1160_vm2, %v3441_v18, %v1601_v21  ;;  %v1156_v43 = vcvt.f32.s32 %v1155_v4  ;;  %v1632_v38 = vsel %vm663_vm0, %v3444_v53, %v1616_v39  ;;  %v1585_v30 = vcvt.s32.f32 %v1131_v51 }
 0x519   : > { %v1633_v13 = vsel %vm663_vm0, %v3442_v26, %v1617_v31  ;;  %v1586_v3 = vcvt.s32.f32 %v1145_v55  ;;  %1648 = vst [vmem:[%s3097_s12 + $0x58] sm:$0xff] %v1632_v38 }
 0x51a   : > { %1649 = vst [vmem:[%s3097_s12 + $0x60] sm:$0xff] %v1633_v13  ;;  %v1159_v41 = vadd.s32 %v1158_v6, %v1156_v43  ;;  %v1602_v7 = vsel %vm1588_vm8, %v1585_v30, 0.0 }
 0x51b   : > { %v1603_v54 = vsel %vm1588_vm8, %v1586_v3, 0.0  ;;  %v1618_v2 = vsel %vm1160_vm2, %v3447_v9, %v1602_v7 }
 0x51c   : > { %v1619_v40 = vsel %vm1160_vm2, %v3445_v0, %v1603_v54  ;;  %v1587_v47 = vcvt.s32.f32 %v1159_v41  ;;  %v1634_v62 = vsel %vm663_vm0, %v3448_v14, %v1618_v2 }
 0x51d   : > { %v1635_v10 = vsel %vm663_vm0, %v3446_v17, %v1619_v40  ;;  %1650 = vst [vmem:[%s3097_s12 + $0x68] sm:$0xff] %v1634_v62 }
 0x51e   : > { %1651 = vst [vmem:[%s3097_s12 + $0x70] sm:$0xff] %v1635_v10  ;;  %v1604_v50 = vsel %vm1588_vm8, %v1587_v47, 0.0 }
 0x51f   : > { %v1620_v16 = vsel %vm1160_vm2, %v3449_v36, %v1604_v50 }
 0x520   : > { %v1636_v52 = vsel %vm663_vm0, %v3450_v57, %v1620_v16 }
 0x521   : > { %1652 = vst [vmem:[%s3097_s12 + $0x78] sm:$0xff] %v1636_v52 }
 0x522 PF: > { %s15_s15 = sadd.s32 1, %s2070_s15  }
 0x523   : > { %p12_p5 = scmp.ge.s32.totalorder %s15_s15, 4  }
 0x525   :  { %14 = sbr.rel (!%p12_p5) target bundleno = 1 (0x1), region = 77 }

</bundles_post_ra>
